<compile_context>
chip_gen: v7x
topology: tpu7x:2x2x1
jax: 0.10.0
libtpu: 0.0.40
codegen_flags: <defaults>
</compile_context>

<pallas_src>
import math

import jax
import jax.numpy as jnp
from jax.experimental import pallas as pl
from jax.experimental.pallas import tpu as pltpu


def _round_up(x, m):
    return (x + m - 1) // m * m


def _default_tm_max():
    """Max row-tile: 512 on 128-MiB-VMEM chips (v5e/v6e), 256 on v7x (64 MiB)."""
    try:
        vmem = pltpu.get_tpu_info().vmem_capacity_bytes
        return 512 if vmem >= (96 << 20) else 256
    except Exception:  # info query unavailable -> conservative default
        return 256


# ----------------------------------------------------------------------------
# One-time parameter preparation (cache the result; do NOT re-run per call).
# ----------------------------------------------------------------------------
def prepare_params(w1, b1, w2, b2, gamma, beta):
    """Fold LayerNorm affine into fc2 and pad weights to TPU-friendly shapes.

    w1: [input_dim, hid_dim], w2: [hid_dim, hid_dim] (pre-transposed vs torch
    Linear), b1/b2/gamma/beta: [hid_dim].  Returns a dict of padded params.
    """
    D, H = w1.shape
    assert w2.shape == (H, H)
    f32 = jnp.float32
    hp = jax.lax.Precision.HIGHEST

    # Fold LayerNorm affine into fc2:
    #   (h_norm * gamma + beta) @ W2 + b2
    #     == h_norm @ (gamma[:,None] * W2) + (beta @ W2 + b2)
    gamma = gamma.reshape(H).astype(f32)
    beta = beta.reshape(H).astype(f32)
    w2_f32 = w2.astype(f32)
    w2_fold = gamma[:, None] * w2_f32
    b2_fold = jnp.dot(beta.reshape(1, H), w2_f32, precision=hp) \
        + b2.reshape(1, H).astype(f32)

    # Lane-dense hidden/output dim; input dim goes all the way to 128 lanes
    # once it is large enough to make lane-dense loads worthwhile.
    Dp = _round_up(D, 128) if D >= 64 else _round_up(D, 16)
    Hp = _round_up(H, 128)

    w1p = jnp.zeros((Dp, Hp), jnp.bfloat16).at[:D, :H].set(w1.astype(jnp.bfloat16))
    w2p = jnp.zeros((Hp, Hp), jnp.bfloat16).at[:H, :H].set(w2_fold.astype(jnp.bfloat16))
    b1p = jnp.zeros((1, Hp), f32).at[:, :H].set(b1.reshape(1, H).astype(f32))
    b2p = jnp.zeros((1, Hp), f32).at[:, :H].set(b2_fold)

    return {"w1p": w1p, "b1p": b1p, "w2p": w2p, "b2p": b2p,
            "D": D, "H": H, "Dp": Dp, "Hp": Hp}


# ----------------------------------------------------------------------------
# Kernel
# ----------------------------------------------------------------------------
def _make_kernel(inv_h, eps, gelu_approx):
    c_tanh = math.sqrt(2.0 / math.pi)
    inv_sqrt2 = 1.0 / math.sqrt(2.0)

    def kernel(x_ref, w1_ref, b1_ref, w2_ref, b2_ref, o_ref):
        # fc1 on the MXU: bf16 x bf16 -> f32 accumulate
        h = jnp.dot(x_ref[...], w1_ref[...], preferred_element_type=jnp.float32)
        h = h + b1_ref[...]

        if gelu_approx:
            # tanh-approximate GELU: the transcendental runs on the EUP, which
            # has its own VLIW slot (vs. erf's long VALU polynomial).
            h = 0.5 * h * (1.0 + jnp.tanh(c_tanh * (h + 0.044715 * h * h * h)))
        else:
            # exact GELU (erf-based), matching torch.nn.functional.gelu default
            h = 0.5 * h * (1.0 + jax.lax.erf(h * inv_sqrt2))

        # LayerNorm over the REAL hid_dim features.  Padded hidden columns are
        # exactly gelu(0) = 0 (b1 padding is 0), so full-width sums equal the
        # real-column sums; only the divisor uses the real hid_dim.
        s1 = jnp.sum(h, axis=-1, keepdims=True)
        s2 = jnp.sum(h * h, axis=-1, keepdims=True)
        mean = s1 * inv_h
        var = jnp.maximum(s2 * inv_h - mean * mean, 0.0)   # guard one-pass form
        hn = (h - mean) * jax.lax.rsqrt(var + eps)
        # gamma/beta are folded into W2/b2 on the host (no per-tile affine).

        # Dropout: identity in eval mode.
        # TODO(synk): training-mode dropout (pltpu.prng_random_bits mask) is
        # not implemented here.

        # fc2 on the MXU + folded bias.  Zero-padded W2 rows kill the non-zero
        # normalized padding columns; zero-padded W2 cols keep output pad clean.
        out = jnp.dot(hn.astype(jnp.bfloat16), w2_ref[...],
                      preferred_element_type=jnp.float32)
        o_ref[...] = (out + b2_ref[...]).astype(o_ref.dtype)

    return kernel


# ----------------------------------------------------------------------------
# Forward
# ----------------------------------------------------------------------------
def mlp_forward(x, params, *, tm_max=None, out_dtype=jnp.float32,
                gelu_approx=True, min_grid_steps=4):
    """Graph-MLP forward using prepared (padded/folded) params.

    x: [N, input_dim].  out_dtype=jnp.bfloat16 halves the dominant HBM write
    stream (recommended on v5e if the consumer tolerates bf16).
    """
    N, D = x.shape
    assert D == params["D"], "x feature dim does not match prepared params"
    Dp, Hp, H = params["Dp"], params["Hp"], params["H"]

    if tm_max is None:
        tm_max = _default_tm_max()
    tm_max = _round_up(tm_max, 8)

    # Row tile sized from N: padding waste < one tile, and at least
    # `min_grid_steps` parallel grid steps (>= 2 per TensorCore on v7x) so the
    # input/output DMA pipeline keeps depth after megacore splitting.
    g = max(min_grid_steps, pl.cdiv(N, tm_max))
    tm = min(_round_up(pl.cdiv(N, g), 8), tm_max)
    Np = _round_up(N, tm)
    grid = (Np // tm,)

    # Pad / cast x only when actually required.
    x_bf16 = x if x.dtype == jnp.bfloat16 else x.astype(jnp.bfloat16)
    if (Np, Dp) == (N, D):
        xp = x_bf16
    else:
        xp = jnp.zeros((Np, Dp), jnp.bfloat16).at[:N, :D].set(x_bf16)

    # Explicit VMEM budget: single-buffered resident weights + double-buffered
    # streaming tiles, with generous headroom, capped under v7x's 64 MiB.
    out_itemsize = jnp.dtype(out_dtype).itemsize
    resident = (Dp * Hp + Hp * Hp) * 2 + 2 * Hp * 4          # W1+W2 (bf16), b1+b2 (f32)
    streamed = 2 * tm * Dp * 2 + 2 * tm * Hp * out_itemsize  # x / out tiles, 2-deep
    vmem_limit = int(min(60 << 20, max(32 << 20, 2 * (resident + streamed) + (8 << 20))))
    # TODO(synk): for very large hid_dim (bf16 W2 alone approaching the v7x
    # VMEM ceiling), add a K/N tiling grid axis ("arbitrary") for fc2 with an
    # f32 VMEM accumulator instead of keeping W2 whole-resident.

    kernel = _make_kernel(1.0 / float(H), 1e-6, gelu_approx)

    def run(single_buffer_weights):
        # Grid-invariant operands do not need double buffers.
        wmode = ({"pipeline_mode": pl.Buffered(1)}
                 if single_buffer_weights else {})
        grid_spec = pltpu.PrefetchScalarGridSpec(
            num_scalar_prefetch=0,
            grid=grid,
            in_specs=[
                pl.BlockSpec((tm, Dp), lambda i: (i, 0)),           # x row tile (pipelined)
                pl.BlockSpec((Dp, Hp), lambda i: (0, 0), **wmode),  # W1 (grid-invariant)
                pl.BlockSpec((1, Hp), lambda i: (0, 0), **wmode),   # b1
                pl.BlockSpec((Hp, Hp), lambda i: (0, 0), **wmode),  # W2 (gamma folded in)
                pl.BlockSpec((1, Hp), lambda i: (0, 0), **wmode),   # b2 (beta folded in)
            ],
            out_specs=pl.BlockSpec((tm, Hp), lambda i: (i, 0)),
        )
        return pl.pallas_call(
            kernel,
            out_shape=jax.ShapeDtypeStruct((Np, Hp), out_dtype),
            grid_spec=grid_spec,
            compiler_params=pltpu.CompilerParams(
                dimension_semantics=("parallel",),   # megacore split on v7x
                vmem_limit_bytes=vmem_limit,
            ),
        )(xp, params["w1p"], params["b1p"], params["w2p"], params["b2p"])

    try:
        out = run(True)
    except Exception:
        # pipeline_mode=pl.Buffered(1) not supported by this jax version:
        # fall back to default (double-buffered) specs; semantics unchanged.
        out = run(False)

    return out[:N, :H]


# ----------------------------------------------------------------------------
# Init + pure-JAX reference (for verification)
# ----------------------------------------------------------------------------
def init_params(key, input_dim, hid_dim):
    """Match Mlp._init_weights: xavier_uniform W, normal(std=1e-6) b, LN (1, 0)."""
    k1, k2, k3, k4 = jax.random.split(key, 4)

    def xavier(k, fan_in, fan_out):
        a = math.sqrt(6.0 / (fan_in + fan_out))
        # stored as [in, out] (transpose of torch's [out, in] Linear weight)
        return jax.random.uniform(k, (fan_in, fan_out), jnp.float32, -a, a)

    w1 = xavier(k1, input_dim, hid_dim)
    w2 = xavier(k2, hid_dim, hid_dim)
    b1 = jax.random.normal(k3, (hid_dim,), jnp.float32) * 1e-6
    b2 = jax.random.normal(k4, (hid_dim,), jnp.float32) * 1e-6
    gamma = jnp.ones((hid_dim,), jnp.float32)
    beta = jnp.zeros((hid_dim,), jnp.float32)
    return w1, b1, w2, b2, gamma, beta


def mlp_reference(x, w1, b1, w2, b2, gamma, beta, *, mimic_bf16=False,
                  gelu_approx=False):
    """Pure-JAX reference. mimic_bf16 reproduces the kernel's bf16 matmul inputs."""
    f32 = jnp.float32
    hp = jax.lax.Precision.HIGHEST
    q = (lambda a: a.astype(jnp.bfloat16).astype(f32)) if mimic_bf16 else (lambda a: a)

    h = jnp.dot(q(x), q(w1), precision=hp) + b1.reshape(1, -1)
    if gelu_approx:
        c = math.sqrt(2.0 / math.pi)
        h = 0.5 * h * (1.0 + jnp.tanh(c * (h + 0.044715 * h ** 3)))
    else:
        h = 0.5 * h * (1.0 + jax.lax.erf(h * (1.0 / math.sqrt(2.0))))
    mean = jnp.mean(h, axis=-1, keepdims=True)
    var = jnp.mean(jnp.square(h - mean), axis=-1, keepdims=True)
    hn = (h - mean) / jnp.sqrt(var + 1e-6)
    if mimic_bf16:
        w2_fold = gamma.reshape(-1, 1) * w2
        b2_fold = jnp.dot(beta.reshape(1, -1), w2, precision=hp) + b2.reshape(1, -1)
        return jnp.dot(q(hn), q(w2_fold), precision=hp) + b2_fold
    hn = hn * gamma.reshape(1, -1) + beta.reshape(1, -1)
    return jnp.dot(hn, w2, precision=hp) + b2.reshape(1, -1)


if __name__ == "__main__":
    key = jax.random.PRNGKey(0)
    kx, kp, kg, kb = jax.random.split(key, 4)

    # Small graph-MLP sizes; N / input_dim / hid_dim deliberately NOT multiples
    # of the tile sizes so the padding paths are exercised.
    N, input_dim, hid_dim = 300, 52, 96
    x = jax.random.normal(kx, (N, input_dim), jnp.float32)
    w1, b1, w2, b2, gamma, beta = init_params(kp, input_dim, hid_dim)
    # Perturb LN affine away from (1, 0) so the gamma/beta -> W2/b2 folding is
    # genuinely tested.
    gamma = gamma + 0.1 * jax.random.normal(kg, (hid_dim,), jnp.float32)
    beta = beta + 0.1 * jax.random.normal(kb, (hid_dim,), jnp.float32)

    # One-time parameter preparation (cached across forward calls).
    params = jax.block_until_ready(prepare_params(w1, b1, w2, b2, gamma, beta))

    out = mlp_forward(x, params)                  # tanh-GELU, f32 output
    out = jax.block_until_ready(out)
    assert out.shape == (N, hid_dim)
    assert out.dtype == jnp.float32

    # Strict check vs a reference that mimics the bf16 matmul inputs and the
    # same (tanh) GELU the kernel uses.
    ref_q = mlp_reference(x, w1, b1, w2, b2, gamma, beta,
                          mimic_bf16=True, gelu_approx=True)
    assert jnp.allclose(out, ref_q, atol=2e-2, rtol=2e-2), \
        "mismatch vs bf16-matmul reference"

    # Sanity check vs the full-f32, exact-erf PyTorch-equivalent reference
    # (bf16 weights + tanh-GELU give ~1e-2-level absolute error on O(1) outputs).
    ref_f = mlp_reference(x, w1, b1, w2, b2, gamma, beta,
                          mimic_bf16=False, gelu_approx=False)
    assert jnp.allclose(out, ref_f, atol=1e-1, rtol=1e-1), \
        "mismatch vs f32 reference"

    print("KERNEL_OK")
</pallas_src>

<mosaic_0001>
module attributes {stable_mosaic.version = 11 : i64} {
  func.func @kernel(%arg0: i32, %arg1: memref<80x64xbf16, #tpu.memory_space<vmem>>, %arg2: memref<64x128xbf16, #tpu.memory_space<vmem>>, %arg3: memref<1x128xf32, #tpu.memory_space<vmem>>, %arg4: memref<128x128xbf16, #tpu.memory_space<vmem>>, %arg5: memref<1x128xf32, #tpu.memory_space<vmem>>, %arg6: memref<80x128xf32, #tpu.memory_space<vmem>>) attributes {dimension_semantics = [#tpu.dimension_semantics<parallel>], iteration_bounds = array<i64: 4>, scalar_prefetch = 0 : i64, scratch_operands = 0 : i64, tpu.core_type = #tpu.core_type<tc>, window_params = [{transform_indices = @transform_0, window_bounds = array<i64: 80, 64>}, {pipeline_mode = #tpu.pipeline_mode<synchronous>, transform_indices = @transform_1, window_bounds = array<i64: 64, 128>}, {pipeline_mode = #tpu.pipeline_mode<synchronous>, transform_indices = @transform_2, window_bounds = array<i64: 1, 128>}, {pipeline_mode = #tpu.pipeline_mode<synchronous>, transform_indices = @transform_3, window_bounds = array<i64: 128, 128>}, {pipeline_mode = #tpu.pipeline_mode<synchronous>, transform_indices = @transform_4, window_bounds = array<i64: 1, 128>}, {transform_indices = @transform_5, window_bounds = array<i64: 80, 128>}]} {
    %c0 = arith.constant 0 : index
    %c0_0 = arith.constant 0 : index
    %0 = vector.load %arg1[%c0, %c0_0] : memref<80x64xbf16, #tpu.memory_space<vmem>>, vector<80x64xbf16>
    %c0_1 = arith.constant 0 : index
    %c0_2 = arith.constant 0 : index
    %1 = vector.load %arg2[%c0_1, %c0_2] : memref<64x128xbf16, #tpu.memory_space<vmem>>, vector<64x128xbf16>
    %cst = arith.constant dense<0.000000e+00> : vector<80x128xf32>
    %2 = tpu.matmul %0, %1, %cst {dimension_numbers = #tpu.dot_dimension_numbers<[1], [0], [0], [1], [0, 0, 1, 1], [], []>} : vector<80x64xbf16>, vector<64x128xbf16>, vector<80x128xf32> -> vector<80x128xf32>
    %c0_3 = arith.constant 0 : index
    %c0_4 = arith.constant 0 : index
    %3 = vector.load %arg3[%c0_3, %c0_4] : memref<1x128xf32, #tpu.memory_space<vmem>>, vector<1x128xf32>
    %4 = vector.broadcast %3 : vector<1x128xf32> to vector<80x128xf32>
    %5 = arith.addf %2, %4 : vector<80x128xf32>
    %cst_5 = arith.constant 5.000000e-01 : f32
    %6 = vector.broadcast %cst_5 : f32 to vector<80x128xf32>
    %7 = arith.mulf %6, %5 : vector<80x128xf32>
    %cst_6 = arith.constant 4.471500e-02 : f32
    %8 = vector.broadcast %cst_6 : f32 to vector<80x128xf32>
    %9 = arith.mulf %8, %5 : vector<80x128xf32>
    %10 = arith.mulf %9, %5 : vector<80x128xf32>
    %11 = arith.mulf %10, %5 : vector<80x128xf32>
    %12 = arith.addf %5, %11 : vector<80x128xf32>
    %cst_7 = arith.constant 0.797884583 : f32
    %13 = vector.broadcast %cst_7 : f32 to vector<80x128xf32>
    %14 = arith.mulf %13, %12 : vector<80x128xf32>
    %15 = math.tanh %14 : vector<80x128xf32>
    %cst_8 = arith.constant 1.000000e+00 : f32
    %16 = vector.broadcast %cst_8 : f32 to vector<80x128xf32>
    %17 = arith.addf %16, %15 : vector<80x128xf32>
    %18 = arith.mulf %7, %17 : vector<80x128xf32>
    %cst_9 = arith.constant dense<0.000000e+00> : vector<80xf32>
    %19 = vector.multi_reduction <add>, %18, %cst_9 [1] : vector<80x128xf32> to vector<80xf32>
    %20 = vector.shape_cast %19 : vector<80xf32> to vector<80x1xf32>
    %21 = arith.mulf %18, %18 : vector<80x128xf32>
    %cst_10 = arith.constant dense<0.000000e+00> : vector<80xf32>
    %22 = vector.multi_reduction <add>, %21, %cst_10 [1] : vector<80x128xf32> to vector<80xf32>
    %23 = vector.shape_cast %22 : vector<80xf32> to vector<80x1xf32>
    %cst_11 = arith.constant 0.010416667 : f32
    %24 = vector.broadcast %cst_11 : f32 to vector<80x1xf32>
    %25 = arith.mulf %20, %24 : vector<80x1xf32>
    %cst_12 = arith.constant 0.010416667 : f32
    %26 = vector.broadcast %cst_12 : f32 to vector<80x1xf32>
    %27 = arith.mulf %23, %26 : vector<80x1xf32>
    %28 = arith.mulf %25, %25 : vector<80x1xf32>
    %29 = arith.subf %27, %28 : vector<80x1xf32>
    %cst_13 = arith.constant 0.000000e+00 : f32
    %30 = vector.broadcast %cst_13 : f32 to vector<80x1xf32>
    %31 = arith.maximumf %29, %30 : vector<80x1xf32>
    %32 = vector.broadcast %25 : vector<80x1xf32> to vector<80x128xf32>
    %33 = arith.subf %18, %32 : vector<80x128xf32>
    %cst_14 = arith.constant 9.99999997E-7 : f32
    %34 = vector.broadcast %cst_14 : f32 to vector<80x1xf32>
    %35 = arith.addf %31, %34 : vector<80x1xf32>
    %36 = math.rsqrt %35 : vector<80x1xf32>
    %37 = vector.broadcast %36 : vector<80x1xf32> to vector<80x128xf32>
    %38 = arith.mulf %33, %37 : vector<80x128xf32>
    %39 = arith.truncf %38 : vector<80x128xf32> to vector<80x128xbf16>
    %c0_15 = arith.constant 0 : index
    %c0_16 = arith.constant 0 : index
    %40 = vector.load %arg4[%c0_15, %c0_16] : memref<128x128xbf16, #tpu.memory_space<vmem>>, vector<128x128xbf16>
    %cst_17 = arith.constant dense<0.000000e+00> : vector<80x128xf32>
    %41 = tpu.matmul %39, %40, %cst_17 {dimension_numbers = #tpu.dot_dimension_numbers<[1], [0], [0], [1], [0, 0, 1, 1], [], []>} : vector<80x128xbf16>, vector<128x128xbf16>, vector<80x128xf32> -> vector<80x128xf32>
    %c0_18 = arith.constant 0 : index
    %c0_19 = arith.constant 0 : index
    %42 = vector.load %arg5[%c0_18, %c0_19] : memref<1x128xf32, #tpu.memory_space<vmem>>, vector<1x128xf32>
    %43 = vector.broadcast %42 : vector<1x128xf32> to vector<80x128xf32>
    %44 = arith.addf %41, %43 : vector<80x128xf32>
    %c0_20 = arith.constant 0 : index
    %c0_21 = arith.constant 0 : index
    %45 = vector.load %arg6[%c0_20, %c0_21] : memref<80x128xf32, #tpu.memory_space<vmem>>, vector<80x128xf32>
    tpu.vector_store %arg6[%c0_20, %c0_21], %44 {strides = array<i32>} : memref<80x128xf32, #tpu.memory_space<vmem>>, vector<80x128xf32>,
    return
  }
  func.func @transform_0(%arg0: i32) -> (i32, i32) {
    %c0_i32 = arith.constant 0 : i32
    %c0_i32_0 = arith.constant 0 : i32
    return %arg0, %c0_i32 : i32, i32
  }
  func.func @transform_1(%arg0: i32) -> (i32, i32) {
    %c0_i32 = arith.constant 0 : i32
    %c0_i32_0 = arith.constant 0 : i32
    %c0_i32_1 = arith.constant 0 : i32
    return %c0_i32, %c0_i32_0 : i32, i32
  }
  func.func @transform_2(%arg0: i32) -> (i32, i32) {
    %c0_i32 = arith.constant 0 : i32
    %c0_i32_0 = arith.constant 0 : i32
    %c0_i32_1 = arith.constant 0 : i32
    return %c0_i32, %c0_i32_0 : i32, i32
  }
  func.func @transform_3(%arg0: i32) -> (i32, i32) {
    %c0_i32 = arith.constant 0 : i32
    %c0_i32_0 = arith.constant 0 : i32
    %c0_i32_1 = arith.constant 0 : i32
    return %c0_i32, %c0_i32_0 : i32, i32
  }
  func.func @transform_4(%arg0: i32) -> (i32, i32) {
    %c0_i32 = arith.constant 0 : i32
    %c0_i32_0 = arith.constant 0 : i32
    %c0_i32_1 = arith.constant 0 : i32
    return %c0_i32, %c0_i32_0 : i32, i32
  }
  func.func @transform_5(%arg0: i32) -> (i32, i32) {
    %c0_i32 = arith.constant 0 : i32
    %c0_i32_0 = arith.constant 0 : i32
    return %arg0, %c0_i32 : i32, i32
  }
}

module attributes {stable_mosaic.version = 11 : i64} {
  func.func @kernel(%arg0: i32, %arg1: memref<80x64xbf16, #tpu.memory_space<vmem>>, %arg2: memref<64x128xbf16, #tpu.memory_space<vmem>>, %arg3: memref<1x128xf32, #tpu.memory_space<vmem>>, %arg4: memref<128x128xbf16, #tpu.memory_space<vmem>>, %arg5: memref<1x128xf32, #tpu.memory_space<vmem>>, %arg6: memref<80x128xf32, #tpu.memory_space<vmem>>) attributes {dimension_semantics = [#tpu.dimension_semantics<parallel>], iteration_bounds = array<i64: 4>, scalar_prefetch = 0 : i64, scratch_operands = 0 : i64, tpu.core_type = #tpu.core_type<tc>, window_params = [{transform_indices = @transform_0, window_bounds = array<i64: 80, 64>}, {pipeline_mode = #tpu.pipeline_mode<synchronous>, transform_indices = @transform_1, window_bounds = array<i64: 64, 128>}, {pipeline_mode = #tpu.pipeline_mode<synchronous>, transform_indices = @transform_2, window_bounds = array<i64: 1, 128>}, {pipeline_mode = #tpu.pipeline_mode<synchronous>, transform_indices = @transform_3, window_bounds = array<i64: 128, 128>}, {pipeline_mode = #tpu.pipeline_mode<synchronous>, transform_indices = @transform_4, window_bounds = array<i64: 1, 128>}, {transform_indices = @transform_5, window_bounds = array<i64: 80, 128>}]} {
    %c0 = arith.constant 0 : index
    %c0_0 = arith.constant 0 : index
    %0 = vector.load %arg1[%c0, %c0_0] : memref<80x64xbf16, #tpu.memory_space<vmem>>, vector<80x64xbf16>
    %c0_1 = arith.constant 0 : index
    %c0_2 = arith.constant 0 : index
    %1 = vector.load %arg2[%c0_1, %c0_2] : memref<64x128xbf16, #tpu.memory_space<vmem>>, vector<64x128xbf16>
    %cst = arith.constant dense<0.000000e+00> : vector<80x128xf32>
    %2 = tpu.matmul %0, %1, %cst {dimension_numbers = #tpu.dot_dimension_numbers<[1], [0], [0], [1], [0, 0, 1, 1], [], []>} : vector<80x64xbf16>, vector<64x128xbf16>, vector<80x128xf32> -> vector<80x128xf32>
    %c0_3 = arith.constant 0 : index
    %c0_4 = arith.constant 0 : index
    %3 = vector.load %arg3[%c0_3, %c0_4] : memref<1x128xf32, #tpu.memory_space<vmem>>, vector<1x128xf32>
    %4 = vector.broadcast %3 : vector<1x128xf32> to vector<80x128xf32>
    %5 = arith.addf %2, %4 : vector<80x128xf32>
    %cst_5 = arith.constant 5.000000e-01 : f32
    %6 = vector.broadcast %cst_5 : f32 to vector<80x128xf32>
    %7 = arith.mulf %6, %5 : vector<80x128xf32>
    %cst_6 = arith.constant 4.471500e-02 : f32
    %8 = vector.broadcast %cst_6 : f32 to vector<80x128xf32>
    %9 = arith.mulf %8, %5 : vector<80x128xf32>
    %10 = arith.mulf %9, %5 : vector<80x128xf32>
    %11 = arith.mulf %10, %5 : vector<80x128xf32>
    %12 = arith.addf %5, %11 : vector<80x128xf32>
    %cst_7 = arith.constant 0.797884583 : f32
    %13 = vector.broadcast %cst_7 : f32 to vector<80x128xf32>
    %14 = arith.mulf %13, %12 : vector<80x128xf32>
    %15 = math.tanh %14 : vector<80x128xf32>
    %cst_8 = arith.constant 1.000000e+00 : f32
    %16 = vector.broadcast %cst_8 : f32 to vector<80x128xf32>
    %17 = arith.addf %16, %15 : vector<80x128xf32>
    %18 = arith.mulf %7, %17 : vector<80x128xf32>
    %cst_9 = arith.constant dense<0.000000e+00> : vector<80xf32>
    %19 = vector.multi_reduction <add>, %18, %cst_9 [1] : vector<80x128xf32> to vector<80xf32>
    %20 = vector.shape_cast %19 : vector<80xf32> to vector<80x1xf32>
    %21 = arith.mulf %18, %18 : vector<80x128xf32>
    %cst_10 = arith.constant dense<0.000000e+00> : vector<80xf32>
    %22 = vector.multi_reduction <add>, %21, %cst_10 [1] : vector<80x128xf32> to vector<80xf32>
    %23 = vector.shape_cast %22 : vector<80xf32> to vector<80x1xf32>
    %cst_11 = arith.constant 0.010416667 : f32
    %24 = vector.broadcast %cst_11 : f32 to vector<80x1xf32>
    %25 = arith.mulf %20, %24 : vector<80x1xf32>
    %cst_12 = arith.constant 0.010416667 : f32
    %26 = vector.broadcast %cst_12 : f32 to vector<80x1xf32>
    %27 = arith.mulf %23, %26 : vector<80x1xf32>
    %28 = arith.mulf %25, %25 : vector<80x1xf32>
    %29 = arith.subf %27, %28 : vector<80x1xf32>
    %cst_13 = arith.constant 0.000000e+00 : f32
    %30 = vector.broadcast %cst_13 : f32 to vector<80x1xf32>
    %31 = arith.maximumf %29, %30 : vector<80x1xf32>
    %32 = vector.broadcast %25 : vector<80x1xf32> to vector<80x128xf32>
    %33 = arith.subf %18, %32 : vector<80x128xf32>
    %cst_14 = arith.constant 9.99999997E-7 : f32
    %34 = vector.broadcast %cst_14 : f32 to vector<80x1xf32>
    %35 = arith.addf %31, %34 : vector<80x1xf32>
    %36 = math.rsqrt %35 : vector<80x1xf32>
    %37 = vector.broadcast %36 : vector<80x1xf32> to vector<80x128xf32>
    %38 = arith.mulf %33, %37 : vector<80x128xf32>
    %39 = arith.truncf %38 : vector<80x128xf32> to vector<80x128xbf16>
    %c0_15 = arith.constant 0 : index
    %c0_16 = arith.constant 0 : index
    %40 = vector.load %arg4[%c0_15, %c0_16] : memref<128x128xbf16, #tpu.memory_space<vmem>>, vector<128x128xbf16>
    %cst_17 = arith.constant dense<0.000000e+00> : vector<80x128xf32>
    %41 = tpu.matmul %39, %40, %cst_17 {dimension_numbers = #tpu.dot_dimension_numbers<[1], [0], [0], [1], [0, 0, 1, 1], [], []>} : vector<80x128xbf16>, vector<128x128xbf16>, vector<80x128xf32> -> vector<80x128xf32>
    %c0_18 = arith.constant 0 : index
    %c0_19 = arith.constant 0 : index
    %42 = vector.load %arg5[%c0_18, %c0_19] : memref<1x128xf32, #tpu.memory_space<vmem>>, vector<1x128xf32>
    %43 = vector.broadcast %42 : vector<1x128xf32> to vector<80x128xf32>
    %44 = arith.addf %41, %43 : vector<80x128xf32>
    %c0_20 = arith.constant 0 : index
    %c0_21 = arith.constant 0 : index
    %45 = vector.load %arg6[%c0_20, %c0_21] : memref<80x128xf32, #tpu.memory_space<vmem>>, vector<80x128xf32>
    tpu.vector_store %arg6[%c0_20, %c0_21], %44 {strides = array<i32>} : memref<80x128xf32, #tpu.memory_space<vmem>>, vector<80x128xf32>,
    return
  }
  func.func @transform_0(%arg0: i32) -> (i32, i32) {
    %c0_i32 = arith.constant 0 : i32
    %c0_i32_0 = arith.constant 0 : i32
    return %arg0, %c0_i32 : i32, i32
  }
  func.func @transform_1(%arg0: i32) -> (i32, i32) {
    %c0_i32 = arith.constant 0 : i32
    %c0_i32_0 = arith.constant 0 : i32
    %c0_i32_1 = arith.constant 0 : i32
    return %c0_i32, %c0_i32_0 : i32, i32
  }
  func.func @transform_2(%arg0: i32) -> (i32, i32) {
    %c0_i32 = arith.constant 0 : i32
    %c0_i32_0 = arith.constant 0 : i32
    %c0_i32_1 = arith.constant 0 : i32
    return %c0_i32, %c0_i32_0 : i32, i32
  }
  func.func @transform_3(%arg0: i32) -> (i32, i32) {
    %c0_i32 = arith.constant 0 : i32
    %c0_i32_0 = arith.constant 0 : i32
    %c0_i32_1 = arith.constant 0 : i32
    return %c0_i32, %c0_i32_0 : i32, i32
  }
  func.func @transform_4(%arg0: i32) -> (i32, i32) {
    %c0_i32 = arith.constant 0 : i32
    %c0_i32_0 = arith.constant 0 : i32
    %c0_i32_1 = arith.constant 0 : i32
    return %c0_i32, %c0_i32_0 : i32, i32
  }
  func.func @transform_5(%arg0: i32) -> (i32, i32) {
    %c0_i32 = arith.constant 0 : i32
    %c0_i32_0 = arith.constant 0 : i32
    return %arg0, %c0_i32 : i32, i32
  }
}

</mosaic_0001>

<bundles_post_ra>
// kernel: tpu_custom_call.1
= control target key start
LH: loop header
LB: loop body
LE: loop exit
PB: predicated region body
PF: predicated region fallthrough
CT: control target
= control target key end

     0   :  { %10 = vsyncpa [#allocation3], 0  ;;  %s1559_s0 = inlined_call_operand.vmem [shape: bf16[320,64], index: 0, kind: input, shape index: {}]   ;;  %s1560_s1 = inlined_call_operand.vmem [shape: bf16[64,128], index: 1, kind: input, shape index: {}]   ;;  %s1561_s2 = inlined_call_operand.vmem [shape: f32[1,128], index: 2, kind: input, shape index: {}]   ;;  %s1562_s3 = inlined_call_operand.vmem [shape: bf16[128,128], index: 3, kind: input, shape index: {}]   ;;  %s1563_s4 = inlined_call_operand.vmem [shape: f32[1,128], index: 4, kind: input, shape index: {}]   ;;  %s1564_s5 = inlined_call_operand.hbm [shape: f32[320,128], index: 5, kind: output, shape index: {}]  }
   0x1   :  { %12 = vsyncpa [#allocation3 + $0x1], 0  ;;  %s1190_s18 = smov 0   ;;  %s1192_s19 = smov 0  }
   0x2   :  { %s1194_s20 = smov 0   ;;  %s1196_s21 = smov 0  }
   0x3 LB: > { %s1211_s22 = sadd.s32 4294967295, %s1153_s21   ;;  %s855_s23 = sadd.s32 4294967294, %s1153_s21   ;;  %s1153_s21 = sphi %s1196_s21, %s1570_s21   ;;  %s1149_s20 = sphi %s1194_s20, %s1569_s20   ;;  %s1145_s19 = sphi %s1192_s19, %s1568_s19   ;;  %s1141_s18 = sphi %s1190_s18, %s1567_s18  }
   0x4   : > { %s1215_s24 = sadd.s32 1, %s1153_s21   ;;  %s135_s25 = sadd.s32 1, %s1149_s20 }
   0x5   : > { %s132_s26 = ssub.s32 %s1153_s21, %s1215_s24  ;;  %p145_p0 = scmp.ne.s32.totalorder %s1149_s20, %s1145_s19 }
   0x6   : > { %p133_p1 = scmp.eq.s32.totalorder %s132_s26, 0  ;;  %p146_p2 = scmp.eq.s32.totalorder %s1211_s22, 3 }
   0x7   : > { %p151_p3 = scmp.ne.s32.totalorder %s1145_s19, %s1141_s18  ;;  %p152_p4 = scmp.eq.s32.totalorder %s855_s23, 3 }
   0x8   : > { %s1226_s27 = scalar_select %p133_p1, %s1149_s20, %s135_s25  }
   0x9   : > { %p1228_p5 = por %p146_p2, %p145_p0  ;;  %p1232_p6 = por %p152_p4, %p151_p3 }
   0xa   : > { %p858_p7 = scmp.ge.s32.totalorder %s1153_s21, 1  ;;  %p191_p8 = scmp.lt.s32.totalorder %s1153_s21, 5 }
   0xc   : > { %p192_p9 = pnand %p858_p7, %p191_p8 }
   0xd   : > { %v1034_v0 = vld [vmem:[%s1560_s1] sm:$0xff] (!%p192_p9)   ;;  %v1155_v1 = vmov (!%p192_p9), 0.0   ;;  %v1035_v2 = vld [vmem:[%s1560_s1 + $0x8] sm:$0xff] (!%p192_p9)   ;;  %vm1156_vm0 = vmmov (!%p192_p9), 0   ;;  %s219_s9 = smul.u32 (!%p192_p9), 10, %s1211_s22  ;;  %v1036_v3 = vld [vmem:[%s1560_s1 + $0x10] sm:$0xff] (!%p192_p9)  }
   0xe   : > { %195 = sbr.rel (%p192_p9) target bundleno = 705 (0x2c1), region = 40  ;;  %910 = vmatprep.subr.bf16.mxu0 (!%p192_p9), %v1155_v1  ;;  %974 = vmatprep.subr.bf16.mxu1 (!%p192_p9), %v1155_v1  ;;  %v1037_v4 = vld [vmem:[%s1560_s1 + $0x18] sm:$0xff] (!%p192_p9)   ;;  %vm301_vm1 = vcmask (!%p192_p9), 523264   ;;  %v1277_v10 = vld [vmem:[%s1561_s2] ss:$0 sm:$0xff] (!%p192_p9)  ;;  %s216_s26 = sand.u32 (!%p192_p9), 1, %s1145_s19  }
   0xf   : > { %911 = vmatpush3.bf16.msra.mxu0 (!%p192_p9), %v1034_v0  ;;  %918 = vmatprep.mubr.msk.bf16.mxu0 (!%p192_p9), %vm1156_vm0, %v1155_v1  ;;  %p220_p10 = scmp.lt.s32.totalorder (!%p192_p9), %s219_s9, 39  ;;  %s990_s30 = smul.u32 (!%p192_p9), 80, %s216_s26 }
  0x10   : > { %912 = vmatprep.subr.bf16.mxu0 (!%p192_p9), %v1155_v1  ;;  %958 = vmatprep.mubr.msk.bf16.mxu1 (!%p192_p9), %vm1156_vm0, %v1155_v1 }
  0x11   : > { %s1495_s8 = scalar_lea.vmem (!%p192_p9), [#allocation2], %s990_s30 }
  0x12   : > { %s793_s10 = sshll.u32 (!%p192_p9), %s1495_s8, 4  ;;  %s1507_s10 = int_to_ptr.vmem [resolvable:$true] %s793_s10 }
  0x13   : > { %913 = vmatpush3.bf16.msra.mxu0 (!%p192_p9), %v1035_v2  ;;  %s1091_s14 = scalar_lea.vmem (!%p192_p9), %s1507_s10, 1280 }
  0x14   : > { %914 = vmatprep.subr.bf16.mxu0 (!%p192_p9), %v1155_v1  ;;  %p1092_p11 = scmp.ne.s32.totalorder (!%p192_p9), %s1507_s10, %s1091_s14 }
  0x15   : > { %s1572_s9 = smov (!%p220_p10, %s219_s9), 39 }
  0x16   : > { %s859_s12 = sshll.u32 %s1572_s9, 2  ;;  %s887_s9 = smul.u32 1280, %s1211_s22 }
  0x17   : > { %s223_s15 = scalar_lea.vmem %s1559_s0, %s859_s12  ;;  %915 = vmatpush3.bf16.msra.mxu0 %v1036_v3  ;;  %s1518_s22 = scalar_lea.sflag [#allocation3], %s216_s26 }
  0x18   : > { %916 = vmatprep.subr.bf16.mxu0 %v1155_v1  ;;  %v1038_v5 = vld [vmem:[%s223_s15] sm:$0xff]   ;;  %v1039_v6 = vld [vmem:[%s223_s15 + $0x8] sm:$0xff]   ;;  %v1040_v7 = vld [vmem:[%s223_s15 + $0x10] sm:$0xff]   ;;  %s1513_s13 = scalar_lea.hbm %s1564_s5, %s887_s9  ;;  %p1093_p12 = pnand %p1092_p11, %p1228_p5 }
  0x19   : > { %v1041_v8 = vld [vmem:[%s223_s15 + $0x18] sm:$0xff]   ;;  %v1042_v9 = vld [vmem:[%s223_s15 + $0x20] sm:$0xff]   ;;  %s1157_s15 = smov [#allocation2]  }
  0x1a   : > { %p1094_p13 = pneg %p1093_p12  ;;  %s1095_s16 = sshll.u32 %s1157_s15, 4  ;;  %s1096_s16 = int_to_ptr.vmem [resolvable:$false] %s1095_s16 }
  0x1b   : > { %917 = vmatpush3.bf16.msra.mxu0 %v1037_v4  ;;  %s1097_s17 = scalar_lea.vmem %s1096_s16, 2560  ;;  %p1098_p0 = scmp.lt.s32.totalorder %s1507_s10, %s1096_s16 }
  0x1c   : > { %938 = vmatprep.subr.bf16.mxu0 %v1155_v1  ;;  %p1099_p1 = scmp.lt.s32.totalorder %s1097_s17, %s1091_s14 }
  0x1e   : > { %919 = vmatmul.mubr.msk.bf16.vlgmr.msra.gmra.mrb[0].mxu0 %vm301_vm1, %v1038_v5  ;;  %p1100_p2 = por %p1099_p1, %p1098_p0 }
  0x1f   : > { %922 = vmatprep.mubr.msk.bf16.mxu0 %vm1156_vm0, %v1155_v1 }
  0x20   : > { %p1101_p3 = pnand %p1100_p2, %p1094_p13 }
  0x26   : > { %923 = vmatmul.mubr.msk.bf16.gmra.mrb[4].mxu0 %vm301_vm1, %v1039_v6 }
  0x27   : > { %926 = vmatprep.mubr.msk.bf16.mxu0 %vm1156_vm0, %v1155_v1 }
  0x2e   : > { %927 = vmatmul.mubr.msk.bf16.gmra.mrb[8].mxu0 %vm301_vm1, %v1040_v7 }
  0x2f   : > { %930 = vmatprep.mubr.msk.bf16.mxu0 %vm1156_vm0, %v1155_v1 }
  0x36   : > { %931 = vmatmul.mubr.msk.bf16.gmra.mrb[12].mxu0 %vm301_vm1, %v1041_v8 }
  0x37   : > { %934 = vmatprep.mubr.msk.bf16.mxu0 %vm1156_vm0, %v1155_v1 }
  0x3e   : > { %935 = vmatmul.mubr.msk.bf16.gmra.mrb[16].mxu0 %vm301_vm1, %v1042_v9 }
  0x3f   : > { %954 = vmatprep.mubr.msk.bf16.mxu0 %vm1156_vm0, %v1155_v1 }
  0xf1   : > { %v351_v11 = vpop.f32.mrb[0].mxu0 }
  0xf2   : > { %v352_v12 = vadd.f32 %v1277_v10, %v351_v11  ;;  %v920_v13 = vpop.f32.mrb[1].mxu0 }
  0xf3   : > { %v354_v14 = vpop.f32.mrb[2].mxu0 }
  0xf4   : > { %v400_v15 = vmul.f32 0.044715, %v352_v12  ;;  %v355_v16 = vadd.f32 %v1277_v10, %v354_v14  ;;  %v921_v17 = vpop.f32.mrb[3].mxu0  ;;  %v390_v56 = vmul.f32 0.5, %v352_v12 }
  0xf6   : > { %v410_v18 = vmul.f32 %v400_v15, %v352_v12  ;;  %v401_v19 = vmul.f32 0.044715, %v355_v16  ;;  %v391_v2 = vmul.f32 0.5, %v355_v16 }
  0xf8   : > { %v411_v20 = vmul.f32 %v401_v19, %v355_v16  ;;  %v420_v21 = vmul.f32 %v410_v18, %v352_v12 }
  0xf9   : > { %v359_v22 = vpop.f32.mrb[4].mxu0 }
  0xfa   : > { %v1282_v23 = vadd.f32 %v1277_v10, %v359_v22  ;;  %v924_v24 = vpop.f32.mrb[5].mxu0  ;;  %v430_v25 = vadd.f32 %v420_v21, %v352_v12  ;;  %v421_v26 = vmul.f32 %v411_v20, %v355_v16 }
  0xfb   : > { %v362_v27 = vpop.f32.mrb[6].mxu0 }
  0xfc   : > { %v402_v28 = vmul.f32 0.044715, %v1282_v23  ;;  %v1286_v29 = vadd.f32 %v1277_v10, %v362_v27  ;;  %v925_v30 = vpop.f32.mrb[7].mxu0  ;;  %v440_v31 = vmul.f32 0.7978846, %v430_v25  ;;  %v431_v32 = vadd.f32 %v421_v26, %v355_v16 }
  0xfd   : > { %v392_v19 = vmul.f32 0.5, %v1282_v23 }
  0xfe   : > { %v412_v33 = vmul.f32 %v402_v28, %v1282_v23  ;;  %v403_v34 = vmul.f32 0.044715, %v1286_v29  ;;  %1051 = vtanh.f32 %v440_v31  ;;  %v441_v35 = vmul.f32 0.7978846, %v431_v32 }
  0xff   : > { %v393_v30 = vmul.f32 0.5, %v1286_v29 }
 0x100   : > { %v413_v36 = vmul.f32 %v403_v34, %v1286_v29  ;;  %1053 = vtanh.f32 %v441_v35  ;;  %v422_v37 = vmul.f32 %v412_v33, %v1282_v23 }
 0x101   : > { %v367_v38 = vpop.f32.mrb[8].mxu0 }
 0x102   : > { %v1293_v39 = vadd.f32 %v1277_v10, %v367_v38  ;;  %v928_v40 = vpop.f32.mrb[9].mxu0  ;;  %v432_v41 = vadd.f32 %v422_v37, %v1282_v23  ;;  %v423_v42 = vmul.f32 %v413_v36, %v1286_v29 }
 0x103   : > { %v370_v43 = vpop.f32.mrb[10].mxu0 }
 0x104   : > { %v404_v44 = vmul.f32 0.044715, %v1293_v39  ;;  %v1299_v45 = vadd.f32 %v1277_v10, %v370_v43  ;;  %v929_v46 = vpop.f32.mrb[11].mxu0  ;;  %v442_v47 = vmul.f32 0.7978846, %v432_v41  ;;  %v433_v48 = vadd.f32 %v423_v42, %v1286_v29 }
 0x106   : > { %v414_v49 = vmul.f32 %v404_v44, %v1293_v39  ;;  %v405_v50 = vmul.f32 0.044715, %v1299_v45  ;;  %1055 = vtanh.f32 %v442_v47  ;;  %v443_v51 = vmul.f32 0.7978846, %v433_v48 }
 0x108   : > { %v1052_v52 = vpop.eup %1051  ;;  %v415_v53 = vmul.f32 %v405_v50, %v1299_v45  ;;  %1057 = vtanh.f32 %v443_v51  ;;  %v424_v54 = vmul.f32 %v414_v49, %v1293_v39  ;;  %v395_v49 = vmul.f32 0.5, %v1299_v45 }
 0x109   : > { %v375_v55 = vpop.f32.mrb[12].mxu0  ;;  %v460_v57 = vadd.f32 1.0, %v1052_v52 }
 0x10a   : > { %v1054_v58 = vpop.eup %1053  ;;  %v1307_v59 = vadd.f32 %v1277_v10, %v375_v55  ;;  %v932_v60 = vpop.f32.mrb[13].mxu0  ;;  %v425_v61 = vmul.f32 %v415_v53, %v1299_v45  ;;  %v434_v62 = vadd.f32 %v424_v54, %v1293_v39  ;;  %v394_v55 = vmul.f32 0.5, %v1293_v39 }
 0x10b   : > { %v378_v63 = vpop.f32.mrb[14].mxu0  ;;  %v1311_v0 = vmul.f32 %v460_v57, %v390_v56  ;;  %v461_v3 = vadd.f32 1.0, %v1054_v58 }
 0x10c   : > { %v406_v4 = vmul.f32 0.044715, %v1307_v59  ;;  %v1315_v5 = vadd.f32 %v1277_v10, %v378_v63  ;;  %v933_v6 = vpop.f32.mrb[15].mxu0  ;;  %v435_v7 = vadd.f32 %v425_v61, %v1299_v45  ;;  %v444_v8 = vmul.f32 0.7978846, %v434_v62  ;;  %v1043_v45 = vld [vmem:[%s1562_s3] sm:$0xff]  }
 0x10d   : > { %480 = vadd.xlane.f32.xlu0 %v1311_v0  ;;  %v1319_v9 = vmul.f32 %v461_v3, %v391_v2  ;;  %v500_v48 = vmul.f32 %v1311_v0, %v1311_v0  ;;  %982 = vmatpush3.bf16.msra.mxu1 %v1043_v45  ;;  %v1044_v3 = vld [vmem:[%s1562_s3 + $0x8] sm:$0xff]   ;;  %v396_v6 = vmul.f32 0.5, %v1307_v59 }
 0x10e   : > { %v416_v11 = vmul.f32 %v406_v4, %v1307_v59  ;;  %v407_v12 = vmul.f32 0.044715, %v1315_v5  ;;  %v445_v13 = vmul.f32 0.7978846, %v435_v7  ;;  %1059 = vtanh.f32 %v444_v8  ;;  %939 = vmatpush3.bf16.msra.mxu0 %v1043_v45  ;;  %975 = vmatprep.subr.bf16.mxu1 %v1155_v1  ;;  %v1045_v8 = vld [vmem:[%s1562_s3 + $0x10] sm:$0xff]  }
 0x10f   : > { %482 = vadd.xlane.f32.xlu1 %v1319_v9  ;;  %v501_v18 = vmul.f32 %v1319_v9, %v1319_v9  ;;  %v397_v62 = vmul.f32 0.5, %v1315_v5  ;;  %940 = vmatprep.subr.bf16.mxu0 %v1155_v1 }
 0x110   : > { %v1056_v14 = vpop.eup %1055  ;;  %v417_v15 = vmul.f32 %v407_v12, %v1315_v5  ;;  %1061 = vtanh.f32 %v445_v13  ;;  %v426_v16 = vmul.f32 %v416_v11, %v1307_v59 }
 0x111   : > { %v383_v17 = vpop.f32.mrb[16].mxu0  ;;  %v462_v20 = vadd.f32 1.0, %v1056_v14  ;;  %983 = vmatpush3.bf16.msra.mxu1 %v1044_v3 }
 0x112   : > { %v1058_v21 = vpop.eup %1057  ;;  %v1330_v22 = vadd.f32 %v1277_v10, %v383_v17  ;;  %v936_v24 = vpop.f32.mrb[17].mxu0  ;;  %v427_v25 = vmul.f32 %v417_v15, %v1315_v5  ;;  %v436_v26 = vadd.f32 %v426_v16, %v1307_v59  ;;  %941 = vmatpush3.bf16.msra.mxu0 %v1044_v3  ;;  %976 = vmatprep.subr.bf16.mxu1 %v1155_v1  ;;  %v1046_v16 = vld [vmem:[%s1562_s3 + $0x18] sm:$0xff]  }
 0x113   : > { %512 = vadd.xlane.f32.xlu1 %v501_v18  ;;  %v386_v27 = vpop.f32.mrb[18].mxu0  ;;  %v1334_v28 = vmul.f32 %v462_v20, %v392_v19  ;;  %v463_v31 = vadd.f32 1.0, %v1058_v21  ;;  %942 = vmatprep.subr.bf16.mxu0 %v1155_v1  ;;  %v1047_v20 = vld [vmem:[%s1562_s3 + $0x20] sm:$0xff]   ;;  %v1048_v24 = vld [vmem:[%s1562_s3 + $0x28] sm:$0xff]  }
 0x114   : > { %v408_v32 = vmul.f32 0.044715, %v1330_v22  ;;  %v1339_v23 = vadd.f32 %v1277_v10, %v386_v27  ;;  %v937_v33 = vpop.f32.mrb[19].mxu0  ;;  %v437_v34 = vadd.f32 %v427_v25, %v1315_v5  ;;  %v446_v35 = vmul.f32 0.7978846, %v436_v26  ;;  %v1049_v25 = vld [vmem:[%s1562_s3 + $0x30] sm:$0xff]  }
 0x115   : > { %484 = vadd.xlane.f32.xlu0 %v1334_v28  ;;  %v502_v36 = vmul.f32 %v1334_v28, %v1334_v28  ;;  %v1345_v37 = vmul.f32 %v463_v31, %v393_v30  ;;  %984 = vmatpush3.bf16.msra.mxu1 %v1045_v8  ;;  %v398_v18 = vmul.f32 0.5, %v1330_v22  ;;  %v1050_v26 = vld [vmem:[%s1562_s3 + $0x38] sm:$0xff]  }
 0x116   : > { %v418_v38 = vmul.f32 %v408_v32, %v1330_v22  ;;  %v409_v29 = vmul.f32 0.044715, %v1339_v23  ;;  %v447_v40 = vmul.f32 0.7978846, %v437_v34  ;;  %1063 = vtanh.f32 %v446_v35  ;;  %943 = vmatpush3.bf16.msra.mxu0 %v1045_v8  ;;  %977 = vmatprep.subr.bf16.mxu1 %v1155_v1 }
 0x117   : > { %514 = vadd.xlane.f32.xlu1 %v502_v36  ;;  %v503_v43 = vmul.f32 %v1345_v37, %v1345_v37  ;;  %v399_v13 = vmul.f32 0.5, %v1339_v23  ;;  %944 = vmatprep.subr.bf16.mxu0 %v1155_v1 }
 0x118   : > { %v1060_v10 = vpop.eup %1059  ;;  %v419_v41 = vmul.f32 %v409_v29, %v1339_v23  ;;  %1065 = vtanh.f32 %v447_v40  ;;  %v428_v42 = vmul.f32 %v418_v38, %v1330_v22 }
 0x119   : > { %486 = vadd.xlane.f32.xlu0 %v1345_v37  ;;  %v464_v51 = vadd.f32 1.0, %v1060_v10  ;;  %985 = vmatpush3.bf16.msra.mxu1 %v1046_v16 }
 0x11a   : > { %v1062_v44 = vpop.eup %1061  ;;  %v429_v46 = vmul.f32 %v419_v41, %v1339_v23  ;;  %v438_v47 = vadd.f32 %v428_v42, %v1330_v22  ;;  %945 = vmatpush3.bf16.msra.mxu0 %v1046_v16  ;;  %978 = vmatprep.subr.bf16.mxu1 %v1155_v1 }
 0x11b   : > { %516 = vadd.xlane.f32.xlu1 %v503_v43  ;;  %v465_v50 = vadd.f32 1.0, %v1062_v44  ;;  %v1364_v57 = vmul.f32 %v464_v51, %v394_v55  ;;  %946 = vmatprep.subr.bf16.mxu0 %v1155_v1 }
 0x11c   : > { %v439_v52 = vadd.f32 %v429_v46, %v1339_v23  ;;  %v448_v53 = vmul.f32 0.7978846, %v438_v47 }
 0x11d   : > { %510 = vadd.xlane.f32.xlu0 %v500_v48  ;;  %v1360_v54 = vmul.f32 %v465_v50, %v395_v49  ;;  %v504_v39 = vmul.f32 %v1364_v57, %v1364_v57  ;;  %986 = vmatpush3.bf16.msra.mxu1 %v1047_v20 }
 0x11e   : > { %v449_v56 = vmul.f32 0.7978846, %v439_v52  ;;  %1067 = vtanh.f32 %v448_v53  ;;  %947 = vmatpush3.bf16.msra.mxu0 %v1047_v20  ;;  %979 = vmatprep.subr.bf16.mxu1 %v1155_v1 }
 0x11f   : > { %490 = vadd.xlane.f32.xlu1 %v1360_v54  ;;  %v505_v60 = vmul.f32 %v1360_v54, %v1360_v54  ;;  %948 = vmatprep.subr.bf16.mxu0 %v1155_v1 }
 0x120   : > { %v1064_v58 = vpop.eup %1063  ;;  %1069 = vtanh.f32 %v449_v56 }
 0x121   : > { %488 = vadd.xlane.f32.xlu0 %v1364_v57  ;;  %v466_v2 = vadd.f32 1.0, %v1064_v58  ;;  %987 = vmatpush3.bf16.msra.mxu1 %v1048_v24 }
 0x122   : > { %v1066_v61 = vpop.eup %1065  ;;  %949 = vmatpush3.bf16.msra.mxu0 %v1048_v24  ;;  %980 = vmatprep.subr.bf16.mxu1 %v1155_v1 }
 0x123   : > { %520 = vadd.xlane.f32.xlu1 %v505_v60  ;;  %v467_v63 = vadd.f32 1.0, %v1066_v61  ;;  %v1384_v5 = vmul.f32 %v466_v2, %v396_v6  ;;  %950 = vmatprep.subr.bf16.mxu0 %v1155_v1 }
 0x125   : > { %518 = vadd.xlane.f32.xlu0 %v504_v39  ;;  %v1380_v4 = vmul.f32 %v467_v63, %v397_v62  ;;  %v506_v12 = vmul.f32 %v1384_v5, %v1384_v5  ;;  %988 = vmatpush3.bf16.msra.mxu1 %v1049_v25 }
 0x126   : > { %951 = vmatpush3.bf16.msra.mxu0 %v1049_v25  ;;  %981 = vmatprep.subr.bf16.mxu1 %v1155_v1 }
 0x127   : > { %494 = vadd.xlane.f32.xlu1 %v1380_v4  ;;  %v507_v59 = vmul.f32 %v1380_v4, %v1380_v4  ;;  %952 = vmatprep.subr.bf16.mxu0 %v1155_v1 }
 0x128   : > { %v1068_v7 = vpop.eup %1067 }
 0x129   : > { %492 = vadd.xlane.f32.xlu0 %v1384_v5  ;;  %v468_v15 = vadd.f32 1.0, %v1068_v7  ;;  %989 = vmatpush3.bf16.msra.mxu1 %v1050_v26 }
 0x12a   : > { %v1070_v11 = vpop.eup %1069  ;;  %953 = vmatpush3.bf16.msra.mxu0 %v1050_v26 }
 0x12b   : > { %524 = vadd.xlane.f32.xlu1 %v507_v59  ;;  %v469_v14 = vadd.f32 1.0, %v1070_v11  ;;  %v1406_v19 = vmul.f32 %v468_v15, %v398_v18 }
 0x12d   : > { %522 = vadd.xlane.f32.xlu0 %v506_v12  ;;  %v1402_v17 = vmul.f32 %v469_v14, %v399_v13  ;;  %v508_v22 = vmul.f32 %v1406_v19, %v1406_v19 }
 0x12f   : > { %498 = vadd.xlane.f32.xlu1 %v1402_v17  ;;  %v509_v21 = vmul.f32 %v1402_v17, %v1402_v17 }
 0x131   : > { %496 = vadd.xlane.f32.xlu0 %v1406_v19 }
 0x133   : > { %528 = vadd.xlane.f32.xlu1 %v509_v21 }
 0x135   : > { %526 = vadd.xlane.f32.xlu0 %v508_v22 }
 0x19a   : > { %v481_v30 = vpop.xlane.xlu0 %480 }
 0x19b   : > { %v1441_v41 = vmul.f32 0.010416667, %v481_v30 }
 0x19c   : > { %v483_v27 = vpop.xlane.xlu1 %482 }
 0x19d   : > { %v1433_v31 = vmul.f32 0.010416667, %v483_v27  ;;  %v550_v51 = vmul.f32 %v1441_v41, %v1441_v41 }
 0x19f   : > { %v551_v33 = vmul.f32 %v1433_v31, %v1433_v31 }
 0x1a0   : > { %v513_v32 = vpop.xlane.xlu1 %512 }
 0x1a1   : > { %v541_v23 = vmul.f32 0.010416667, %v513_v32 }
 0x1a2   : > { %v485_v34 = vpop.xlane.xlu0 %484 }
 0x1a3   : > { %v1437_v35 = vmul.f32 0.010416667, %v485_v34  ;;  %v561_v36 = vsub.f32 %v541_v23, %v551_v33 }
 0x1a4   : > { %v515_v38 = vpop.xlane.xlu1 %514 }
 0x1a5   : > { %v552_v29 = vmul.f32 %v1437_v35, %v1437_v35  ;;  %v542_v40 = vmul.f32 0.010416667, %v515_v38  ;;  %v571_v44 = vmax.f32 %v561_v36, 0.0 }
 0x1a6   : > { %v487_v10 = vpop.xlane.xlu0 %486 }
 0x1a7   : > { %v562_v42 = vsub.f32 %v542_v40, %v552_v29  ;;  %v1443_v43 = vmul.f32 0.010416667, %v487_v10  ;;  %v591_v53 = vadd.f32 1e-06, %v571_v44  ;;  %v580_v10 = vsub.f32 %v1311_v0, %v1441_v41 }
 0x1a8   : > { %v517_v46 = vpop.xlane.xlu1 %516  ;;  %v582_v44 = vsub.f32 %v1334_v28, %v1437_v35 }
 0x1a9   : > { %v572_v47 = vmax.f32 %v562_v42, 0.0  ;;  %v553_v48 = vmul.f32 %v1443_v43, %v1443_v43  ;;  %v543_v49 = vmul.f32 0.010416667, %v517_v46  ;;  %1071 = vrsqrt.f32 %v591_v53 }
 0x1aa   : > { %v511_v50 = vpop.xlane.xlu0 %510  ;;  %v583_v23 = vsub.f32 %v1345_v37, %v1443_v43  ;;  %v581_v42 = vsub.f32 %v1319_v9, %v1433_v31 }
 0x1ab   : > { %v540_v52 = vmul.f32 0.010416667, %v511_v50  ;;  %v563_v55 = vsub.f32 %v543_v49, %v553_v48  ;;  %v592_v58 = vadd.f32 1e-06, %v572_v47 }
 0x1ac   : > { %v491_v56 = vpop.xlane.xlu1 %490 }
 0x1ad   : > { %v560_v45 = vsub.f32 %v540_v52, %v550_v51  ;;  %v1449_v60 = vmul.f32 0.010416667, %v491_v56  ;;  %v573_v61 = vmax.f32 %v563_v55, 0.0  ;;  %1073 = vrsqrt.f32 %v592_v58 }
 0x1ae   : > { %v489_v39 = vpop.xlane.xlu0 %488 }
 0x1af   : > { %v570_v62 = vmax.f32 %v560_v45, 0.0  ;;  %v1451_v63 = vmul.f32 0.010416667, %v489_v39  ;;  %v593_v2 = vadd.f32 1e-06, %v573_v61  ;;  %v555_v7 = vmul.f32 %v1449_v60, %v1449_v60 }
 0x1b0   : > { %v521_v3 = vpop.xlane.xlu1 %520 }
 0x1b1   : > { %v590_v6 = vadd.f32 1e-06, %v570_v62  ;;  %v545_v8 = vmul.f32 0.010416667, %v521_v3  ;;  %1075 = vrsqrt.f32 %v593_v2  ;;  %v554_v11 = vmul.f32 %v1451_v63, %v1451_v63 }
 0x1b2   : > { %v519_v59 = vpop.xlane.xlu0 %518  ;;  %v585_v3 = vsub.f32 %v1360_v54, %v1449_v60 }
 0x1b3   : > { %1077 = vrsqrt.f32 %v590_v6  ;;  %v565_v12 = vsub.f32 %v545_v8, %v555_v7  ;;  %v544_v13 = vmul.f32 0.010416667, %v519_v59  ;;  %v1072_v32 = vpop.eup %1071  ;;  %v584_v6 = vsub.f32 %v1364_v57, %v1451_v63 }
 0x1b4   : > { %v495_v14 = vpop.xlane.xlu1 %494  ;;  %v611_v53 = vmul.f32 %v1072_v32, %v581_v42 }
 0x1b5   : > { %v575_v15 = vmax.f32 %v565_v12, 0.0  ;;  %v564_v16 = vsub.f32 %v544_v13, %v554_v11  ;;  %v1457_v18 = vmul.f32 0.010416667, %v495_v14 }
 0x1b6   : > { %v493_v20 = vpop.xlane.xlu0 %492 }
 0x1b7   : > { %v595_v21 = vadd.f32 1e-06, %v575_v15  ;;  %v574_v22 = vmax.f32 %v564_v16, 0.0  ;;  %v1459_v24 = vmul.f32 0.010416667, %v493_v20  ;;  %v557_v27 = vmul.f32 %v1457_v18, %v1457_v18  ;;  %v1074_v34 = vpop.eup %1073 }
 0x1b8   : > { %v525_v25 = vpop.xlane.xlu1 %524  ;;  %v612_v51 = vmul.f32 %v1074_v34, %v582_v44  ;;  %v587_v54 = vsub.f32 %v1380_v4, %v1457_v18 }
 0x1b9   : > { %1079 = vrsqrt.f32 %v595_v21  ;;  %v594_v26 = vadd.f32 1e-06, %v574_v22  ;;  %v547_v30 = vmul.f32 0.010416667, %v525_v25  ;;  %v556_v36 = vmul.f32 %v1459_v24, %v1459_v24 }
 0x1ba   : > { %v523_v33 = vpop.xlane.xlu0 %522  ;;  %v586_v57 = vsub.f32 %v1384_v5, %v1459_v24  ;;  %v875_v5 = vld [vmem:[%s1563_s4] ss:$0 sm:$0xff] }
 0x1bb   : > { %1081 = vrsqrt.f32 %v594_v26  ;;  %v567_v38 = vsub.f32 %v547_v30, %v557_v27  ;;  %v546_v29 = vmul.f32 0.010416667, %v523_v33  ;;  %v1076_v40 = vpop.eup %1075 }
 0x1bc   : > { %v499_v46 = vpop.xlane.xlu1 %498  ;;  %v613_v49 = vmul.f32 %v1076_v40, %v583_v23 }
 0x1bd   : > { %v1078_v37 = vpop.eup %1077  ;;  %v577_v43 = vmax.f32 %v567_v38, 0.0  ;;  %v566_v47 = vsub.f32 %v546_v29, %v556_v36  ;;  %v539_v48 = vmul.f32 0.010416667, %v499_v46 }
 0x1be   : > { %v497_v50 = vpop.xlane.xlu0 %496  ;;  %v610_v52 = vmul.f32 %v1078_v37, %v580_v10  ;;  %v621_v0 = vpack.c.bf16 %v613_v49, %v612_v51 }
 0x1bf   : > { %v597_v55 = vadd.f32 1e-06, %v577_v43  ;;  %v576_v56 = vmax.f32 %v566_v47, 0.0  ;;  %v538_v58 = vmul.f32 0.010416667, %v497_v50  ;;  %v559_v31 = vmul.f32 %v539_v48, %v539_v48 }
 0x1c0   : > { %v529_v41 = vpop.xlane.xlu1 %528  ;;  %v620_v45 = vpack.c.bf16 %v611_v53, %v610_v52  ;;  %959 = vmatmul.mubr.bf16.vlgmr.msra.gmra.mrb[0].mxu1 %v621_v0  ;;  %v589_v26 = vsub.f32 %v1402_v17, %v539_v48 }
 0x1c1   : > { %1083 = vrsqrt.f32 %v597_v55  ;;  %v596_v9 = vadd.f32 1e-06, %v576_v56  ;;  %v549_v28 = vmul.f32 0.010416667, %v529_v41  ;;  %v558_v39 = vmul.f32 %v538_v58, %v538_v58  ;;  %962 = vmatprep.mubr.msk.bf16.mxu1 %vm1156_vm0, %v1155_v1 }
 0x1c2   : > { %955 = vmatmul.mubr.bf16.vlgmr.msra.gmra.mrb[20].mxu0 %v620_v45  ;;  %v527_v35 = vpop.xlane.xlu0 %526  ;;  %v588_v27 = vsub.f32 %v1406_v19, %v538_v58 }
 0x1c3   : > { %v1080_v61 = vpop.eup %1079  ;;  %1085 = vrsqrt.f32 %v596_v9  ;;  %v569_v62 = vsub.f32 %v549_v28, %v559_v31  ;;  %v548_v2 = vmul.f32 0.010416667, %v527_v35 }
 0x1c4   : > { %v615_v12 = vmul.f32 %v1080_v61, %v585_v3 }
 0x1c5   : > { %v1082_v7 = vpop.eup %1081  ;;  %v579_v8 = vmax.f32 %v569_v62, 0.0  ;;  %v568_v59 = vsub.f32 %v548_v2, %v558_v39 }
 0x1c6   : > { %v614_v11 = vmul.f32 %v1082_v7, %v584_v6 }
 0x1c7   : > { %v599_v13 = vadd.f32 1e-06, %v579_v8  ;;  %v578_v14 = vmax.f32 %v568_v59, 0.0 }
 0x1c8   : > { %v622_v15 = vpack.c.bf16 %v615_v12, %v614_v11 }
 0x1c9   : > { %1087 = vrsqrt.f32 %v599_v13  ;;  %v598_v16 = vadd.f32 1e-06, %v578_v14 }
 0x1ca   : > { %963 = vmatmul.mubr.bf16.gmra.mrb[4].mxu1 %v622_v15 }
 0x1cb   : > { %v1084_v20 = vpop.eup %1083  ;;  %1089 = vrsqrt.f32 %v598_v16  ;;  %966 = vmatprep.mubr.msk.bf16.mxu1 %vm1156_vm0, %v1155_v1 }
 0x1cc   : > { %v617_v21 = vmul.f32 %v1084_v20, %v587_v54 }
 0x1cd   : > { %v1086_v60 = vpop.eup %1085 }
 0x1ce   : > { %v616_v63 = vmul.f32 %v1086_v60, %v586_v57 }
 0x1d0   : > { %v623_v22 = vpack.c.bf16 %v617_v21, %v616_v63 }
 0x1d2   : > { %967 = vmatmul.mubr.bf16.gmra.mrb[8].mxu1 %v623_v22 }
 0x1d3   : > { %v1088_v25 = vpop.eup %1087  ;;  %970 = vmatprep.mubr.msk.bf16.mxu1 %vm1156_vm0, %v1155_v1 }
 0x1d4   : > { %v619_v18 = vmul.f32 %v1088_v25, %v589_v26 }
 0x1d5   : > { %v1090_v30 = vpop.eup %1089 }
 0x1d6   : > { %v618_v4 = vmul.f32 %v1090_v30, %v588_v27 }
 0x1d8   : > { %v624_v32 = vpack.c.bf16 %v619_v18, %v618_v4 }
 0x1da   : > { %971 = vmatmul.mubr.bf16.gmra.mrb[12].mxu1 %v624_v32 }
 0x293   : > { %v738_v24 = vpop.f32.mrb[0].mxu1 }
 0x294   : > { %v739_v33 = vadd.f32 %v875_v5, %v738_v24  ;;  %v960_v1 = vpop.f32.mrb[1].mxu1 }
 0x295   : > { %v730_v23 = vpop.f32.mrb[20].mxu0  ;;  %v741_v36 = vpop.f32.mrb[2].mxu1 }
 0x296   : > { %v731_v34 = vadd.f32 %v875_v5, %v730_v23  ;;  %v956_v17 = vpop.f32.mrb[21].mxu0  ;;  %771 = vst [vmem:[%s1495_s8 + $0x10] sm:$0xff] %v739_v33  ;;  %v742_v38 = vadd.f32 %v875_v5, %v741_v36  ;;  %v961_v29 = vpop.f32.mrb[3].mxu1 }
 0x297   : > { %v733_v19 = vpop.f32.mrb[22].mxu0 }
 0x298   : > { %769 = vst [vmem:[%s1495_s8] sm:$0xff] %v731_v34  ;;  %v734_v40 = vadd.f32 %v875_v5, %v733_v19  ;;  %v957_v10 = vpop.f32.mrb[23].mxu0  ;;  %772 = vst [vmem:[%s1495_s8 + $0x18] sm:$0xff] %v742_v38 }
 0x29a   : > { %770 = vst [vmem:[%s1495_s8 + $0x8] sm:$0xff] %v734_v40 }
 0x29d   : > { %v746_v42 = vpop.f32.mrb[4].mxu1 }
 0x29e   : > { %v747_v44 = vadd.f32 %v875_v5, %v746_v42  ;;  %v964_v46 = vpop.f32.mrb[5].mxu1 }
 0x29f   : > { %v749_v37 = vpop.f32.mrb[6].mxu1 }
 0x2a0   : > { %773 = vst [vmem:[%s1495_s8 + $0x20] sm:$0xff] %v747_v44  ;;  %v750_v43 = vadd.f32 %v875_v5, %v749_v37  ;;  %v965_v47 = vpop.f32.mrb[7].mxu1 }
 0x2a2   : > { %774 = vst [vmem:[%s1495_s8 + $0x28] sm:$0xff] %v750_v43 }
 0x2a5   : > { %v754_v48 = vpop.f32.mrb[8].mxu1 }
 0x2a6   : > { %v755_v49 = vadd.f32 %v875_v5, %v754_v48  ;;  %v968_v50 = vpop.f32.mrb[9].mxu1 }
 0x2a7   : > { %v757_v51 = vpop.f32.mrb[10].mxu1 }
 0x2a8   : > { %775 = vst [vmem:[%s1495_s8 + $0x30] sm:$0xff] %v755_v49  ;;  %v758_v52 = vadd.f32 %v875_v5, %v757_v51  ;;  %v969_v53 = vpop.f32.mrb[11].mxu1 }
 0x2aa   : > { %776 = vst [vmem:[%s1495_s8 + $0x38] sm:$0xff] %v758_v52 }
 0x2ad   : > { %v762_v55 = vpop.f32.mrb[12].mxu1 }
 0x2ae   : > { %v763_v56 = vadd.f32 %v875_v5, %v762_v55  ;;  %v972_v58 = vpop.f32.mrb[13].mxu1 }
 0x2af   : > { %v765_v0 = vpop.f32.mrb[14].mxu1 }
 0x2b0   : > { %777 = vst [vmem:[%s1495_s8 + $0x40] sm:$0xff] %v763_v56  ;;  %v766_v41 = vadd.f32 %v875_v5, %v765_v0  ;;  %v973_v45 = vpop.f32.mrb[15].mxu1 }
 0x2b2   : > { %778 = vst [vmem:[%s1495_s8 + $0x48] sm:$0xff] %v766_v41 }
 0x2b3   : > { %1104 = shalt.err (!%p1101_p3)
}
 0x2b4   : > { %s1105_s23 = scalar_lea.hbm %s1513_s13, 1280  ;;  %s1109_s30 = scalar_lea.hbm %s1564_s5, 5120 }
 0x2b5   : > { %p1106_p4 = scmp.ne.s32.totalorder %s1513_s13, %s1105_s23  ;;  %p1110_p9 = scmp.lt.u32.totalorder %s1513_s13, %s1564_s5 }
 0x2b6   : > { %p1111_p10 = scmp.lt.u32.totalorder %s1109_s30, %s1105_s23  ;;  %p1113_p12 = scmp.lt.u32.totalorder %s1105_s23, %s1513_s13 }
 0x2b7   : > { %p1107_p7 = pnand %p1106_p4, %p1228_p5 }
 0x2b8   : > { %p1112_p11 = por %p1111_p10, %p1110_p9 }
 0x2b9   : > { %p1108_p8 = pneg %p1107_p7 }
 0x2ba   : > { %p1114_p13 = por %p1113_p12, %p1112_p11 }
 0x2bc   : > { %p1115_p0 = pnand %p1114_p13, %p1108_p8 }
 0x2be   : > { %1118 = shalt.err (!%p1115_p0)
}
 0x2bf   : > { %s1158_s8 = smov 128   ;;  %s1159_s9 = smov 8  }
 0x2c0   : > { %991 = dma.vmem_to_hbm [thread:$0]  (%p1228_p5), %s1507_s10, 1280, %s1513_s13, %s1518_s22, %s1158_s8, %s1158_s8, %s1159_s9  }
 0x2c1 PF: > { %p997_p1 = scmp.ge.s32.totalorder %s1153_s21, 2  ;;  %s808_s11 = sand.u32 1, %s1141_s18  }
 0x2c2   : > { %s809_s12 = scalar_lea.sflag [#allocation3], %s808_s11 }
 0x2c3   : > { %p994_p2 = pnand %p997_p1, %p1232_p6 }
 0x2c5   : > { %1136 = dma.done.wait (!%p994_p2), %s809_s12, 1280  }
 0x2c6   : > { %1138 = vsyncadd (!%p994_p2), %s809_s12, 4294966016  ;;  %p15_p3 = scmp.ge.s32.totalorder %s1215_s24, 6   ;;  %s1567_s18 = smov %s1145_s19 }
 0x2c7   : > { %s1568_s19 = smov %s1149_s20  ;;  %s1569_s20 = smov %s1226_s27 }
 0x2c8   : > { %s1570_s21 = smov %s1215_s24  ;;  %17 = sbr.rel (!%p15_p3) target bundleno = 3 (0x3), region = 75 }
 0x2cf   :  { %814 = vsyncpa [#allocation3], 1 }
 0x2d0   :  { %816 = vsyncpa [#allocation3 + $0x1], 1 }

// kernel: tpu_custom_call.1
= control target key start
LH: loop header
LB: loop body
LE: loop exit
PB: predicated region body
PF: predicated region fallthrough
CT: control target
= control target key end

     0   :  { %10 = vsyncpa [#allocation3], 0  ;;  %s1559_s0 = inlined_call_operand.vmem [shape: bf16[320,64], index: 0, kind: input, shape index: {}]   ;;  %s1560_s1 = inlined_call_operand.vmem [shape: bf16[64,128], index: 1, kind: input, shape index: {}]   ;;  %s1561_s2 = inlined_call_operand.vmem [shape: f32[1,128], index: 2, kind: input, shape index: {}]   ;;  %s1562_s3 = inlined_call_operand.vmem [shape: bf16[128,128], index: 3, kind: input, shape index: {}]   ;;  %s1563_s4 = inlined_call_operand.vmem [shape: f32[1,128], index: 4, kind: input, shape index: {}]   ;;  %s1564_s5 = inlined_call_operand.hbm [shape: f32[320,128], index: 5, kind: output, shape index: {}]  }
   0x1   :  { %12 = vsyncpa [#allocation3 + $0x1], 0  ;;  %s1190_s18 = smov 0   ;;  %s1192_s19 = smov 0  }
   0x2   :  { %s1194_s20 = smov 0   ;;  %s1196_s21 = smov 0  }
   0x3 LB: > { %s1211_s22 = sadd.s32 4294967295, %s1153_s21   ;;  %s855_s23 = sadd.s32 4294967294, %s1153_s21   ;;  %s1153_s21 = sphi %s1196_s21, %s1570_s21   ;;  %s1149_s20 = sphi %s1194_s20, %s1569_s20   ;;  %s1145_s19 = sphi %s1192_s19, %s1568_s19   ;;  %s1141_s18 = sphi %s1190_s18, %s1567_s18  }
   0x4   : > { %s1215_s24 = sadd.s32 1, %s1153_s21   ;;  %s135_s25 = sadd.s32 1, %s1149_s20 }
   0x5   : > { %s132_s26 = ssub.s32 %s1153_s21, %s1215_s24  ;;  %p145_p0 = scmp.ne.s32.totalorder %s1149_s20, %s1145_s19 }
   0x6   : > { %p133_p1 = scmp.eq.s32.totalorder %s132_s26, 0  ;;  %p146_p2 = scmp.eq.s32.totalorder %s1211_s22, 3 }
   0x7   : > { %p151_p3 = scmp.ne.s32.totalorder %s1145_s19, %s1141_s18  ;;  %p152_p4 = scmp.eq.s32.totalorder %s855_s23, 3 }
   0x8   : > { %s1226_s27 = scalar_select %p133_p1, %s1149_s20, %s135_s25  }
   0x9   : > { %p1228_p5 = por %p146_p2, %p145_p0  ;;  %p1232_p6 = por %p152_p4, %p151_p3 }
   0xa   : > { %p858_p7 = scmp.ge.s32.totalorder %s1153_s21, 1  ;;  %p191_p8 = scmp.lt.s32.totalorder %s1153_s21, 5 }
   0xc   : > { %p192_p9 = pnand %p858_p7, %p191_p8 }
   0xd   : > { %v1034_v0 = vld [vmem:[%s1560_s1] sm:$0xff] (!%p192_p9)   ;;  %v1155_v1 = vmov (!%p192_p9), 0.0   ;;  %v1035_v2 = vld [vmem:[%s1560_s1 + $0x8] sm:$0xff] (!%p192_p9)   ;;  %vm1156_vm0 = vmmov (!%p192_p9), 0   ;;  %s219_s9 = smul.u32 (!%p192_p9), 10, %s1211_s22  ;;  %v1036_v3 = vld [vmem:[%s1560_s1 + $0x10] sm:$0xff] (!%p192_p9)  }
   0xe   : > { %195 = sbr.rel (%p192_p9) target bundleno = 705 (0x2c1), region = 40  ;;  %910 = vmatprep.subr.bf16.mxu0 (!%p192_p9), %v1155_v1  ;;  %974 = vmatprep.subr.bf16.mxu1 (!%p192_p9), %v1155_v1  ;;  %v1037_v4 = vld [vmem:[%s1560_s1 + $0x18] sm:$0xff] (!%p192_p9)   ;;  %vm301_vm1 = vcmask (!%p192_p9), 523264   ;;  %v1277_v10 = vld [vmem:[%s1561_s2] ss:$0 sm:$0xff] (!%p192_p9)  ;;  %s216_s26 = sand.u32 (!%p192_p9), 1, %s1145_s19  }
   0xf   : > { %911 = vmatpush3.bf16.msra.mxu0 (!%p192_p9), %v1034_v0  ;;  %918 = vmatprep.mubr.msk.bf16.mxu0 (!%p192_p9), %vm1156_vm0, %v1155_v1  ;;  %p220_p10 = scmp.lt.s32.totalorder (!%p192_p9), %s219_s9, 39  ;;  %s990_s30 = smul.u32 (!%p192_p9), 80, %s216_s26 }
  0x10   : > { %912 = vmatprep.subr.bf16.mxu0 (!%p192_p9), %v1155_v1  ;;  %958 = vmatprep.mubr.msk.bf16.mxu1 (!%p192_p9), %vm1156_vm0, %v1155_v1 }
  0x11   : > { %s1495_s8 = scalar_lea.vmem (!%p192_p9), [#allocation2], %s990_s30 }
  0x12   : > { %s793_s10 = sshll.u32 (!%p192_p9), %s1495_s8, 4  ;;  %s1507_s10 = int_to_ptr.vmem [resolvable:$true] %s793_s10 }
  0x13   : > { %913 = vmatpush3.bf16.msra.mxu0 (!%p192_p9), %v1035_v2  ;;  %s1091_s14 = scalar_lea.vmem (!%p192_p9), %s1507_s10, 1280 }
  0x14   : > { %914 = vmatprep.subr.bf16.mxu0 (!%p192_p9), %v1155_v1  ;;  %p1092_p11 = scmp.ne.s32.totalorder (!%p192_p9), %s1507_s10, %s1091_s14 }
  0x15   : > { %s1572_s9 = smov (!%p220_p10, %s219_s9), 39 }
  0x16   : > { %s859_s12 = sshll.u32 %s1572_s9, 2  ;;  %s887_s9 = smul.u32 1280, %s1211_s22 }
  0x17   : > { %s223_s15 = scalar_lea.vmem %s1559_s0, %s859_s12  ;;  %915 = vmatpush3.bf16.msra.mxu0 %v1036_v3  ;;  %s1518_s22 = scalar_lea.sflag [#allocation3], %s216_s26 }
  0x18   : > { %916 = vmatprep.subr.bf16.mxu0 %v1155_v1  ;;  %v1038_v5 = vld [vmem:[%s223_s15] sm:$0xff]   ;;  %v1039_v6 = vld [vmem:[%s223_s15 + $0x8] sm:$0xff]   ;;  %v1040_v7 = vld [vmem:[%s223_s15 + $0x10] sm:$0xff]   ;;  %s1513_s13 = scalar_lea.hbm %s1564_s5, %s887_s9  ;;  %p1093_p12 = pnand %p1092_p11, %p1228_p5 }
  0x19   : > { %v1041_v8 = vld [vmem:[%s223_s15 + $0x18] sm:$0xff]   ;;  %v1042_v9 = vld [vmem:[%s223_s15 + $0x20] sm:$0xff]   ;;  %s1157_s15 = smov [#allocation2]  }
  0x1a   : > { %p1094_p13 = pneg %p1093_p12  ;;  %s1095_s16 = sshll.u32 %s1157_s15, 4  ;;  %s1096_s16 = int_to_ptr.vmem [resolvable:$false] %s1095_s16 }
  0x1b   : > { %917 = vmatpush3.bf16.msra.mxu0 %v1037_v4  ;;  %s1097_s17 = scalar_lea.vmem %s1096_s16, 2560  ;;  %p1098_p0 = scmp.lt.s32.totalorder %s1507_s10, %s1096_s16 }
  0x1c   : > { %938 = vmatprep.subr.bf16.mxu0 %v1155_v1  ;;  %p1099_p1 = scmp.lt.s32.totalorder %s1097_s17, %s1091_s14 }
  0x1e   : > { %919 = vmatmul.mubr.msk.bf16.vlgmr.msra.gmra.mrb[0].mxu0 %vm301_vm1, %v1038_v5  ;;  %p1100_p2 = por %p1099_p1, %p1098_p0 }
  0x1f   : > { %922 = vmatprep.mubr.msk.bf16.mxu0 %vm1156_vm0, %v1155_v1 }
  0x20   : > { %p1101_p3 = pnand %p1100_p2, %p1094_p13 }
  0x26   : > { %923 = vmatmul.mubr.msk.bf16.gmra.mrb[4].mxu0 %vm301_vm1, %v1039_v6 }
  0x27   : > { %926 = vmatprep.mubr.msk.bf16.mxu0 %vm1156_vm0, %v1155_v1 }
  0x2e   : > { %927 = vmatmul.mubr.msk.bf16.gmra.mrb[8].mxu0 %vm301_vm1, %v1040_v7 }
  0x2f   : > { %930 = vmatprep.mubr.msk.bf16.mxu0 %vm1156_vm0, %v1155_v1 }
  0x36   : > { %931 = vmatmul.mubr.msk.bf16.gmra.mrb[12].mxu0 %vm301_vm1, %v1041_v8 }
  0x37   : > { %934 = vmatprep.mubr.msk.bf16.mxu0 %vm1156_vm0, %v1155_v1 }
  0x3e   : > { %935 = vmatmul.mubr.msk.bf16.gmra.mrb[16].mxu0 %vm301_vm1, %v1042_v9 }
  0x3f   : > { %954 = vmatprep.mubr.msk.bf16.mxu0 %vm1156_vm0, %v1155_v1 }
  0xf1   : > { %v351_v11 = vpop.f32.mrb[0].mxu0 }
  0xf2   : > { %v352_v12 = vadd.f32 %v1277_v10, %v351_v11  ;;  %v920_v13 = vpop.f32.mrb[1].mxu0 }
  0xf3   : > { %v354_v14 = vpop.f32.mrb[2].mxu0 }
  0xf4   : > { %v400_v15 = vmul.f32 0.044715, %v352_v12  ;;  %v355_v16 = vadd.f32 %v1277_v10, %v354_v14  ;;  %v921_v17 = vpop.f32.mrb[3].mxu0  ;;  %v390_v56 = vmul.f32 0.5, %v352_v12 }
  0xf6   : > { %v410_v18 = vmul.f32 %v400_v15, %v352_v12  ;;  %v401_v19 = vmul.f32 0.044715, %v355_v16  ;;  %v391_v2 = vmul.f32 0.5, %v355_v16 }
  0xf8   : > { %v411_v20 = vmul.f32 %v401_v19, %v355_v16  ;;  %v420_v21 = vmul.f32 %v410_v18, %v352_v12 }
  0xf9   : > { %v359_v22 = vpop.f32.mrb[4].mxu0 }
  0xfa   : > { %v1282_v23 = vadd.f32 %v1277_v10, %v359_v22  ;;  %v924_v24 = vpop.f32.mrb[5].mxu0  ;;  %v430_v25 = vadd.f32 %v420_v21, %v352_v12  ;;  %v421_v26 = vmul.f32 %v411_v20, %v355_v16 }
  0xfb   : > { %v362_v27 = vpop.f32.mrb[6].mxu0 }
  0xfc   : > { %v402_v28 = vmul.f32 0.044715, %v1282_v23  ;;  %v1286_v29 = vadd.f32 %v1277_v10, %v362_v27  ;;  %v925_v30 = vpop.f32.mrb[7].mxu0  ;;  %v440_v31 = vmul.f32 0.7978846, %v430_v25  ;;  %v431_v32 = vadd.f32 %v421_v26, %v355_v16 }
  0xfd   : > { %v392_v19 = vmul.f32 0.5, %v1282_v23 }
  0xfe   : > { %v412_v33 = vmul.f32 %v402_v28, %v1282_v23  ;;  %v403_v34 = vmul.f32 0.044715, %v1286_v29  ;;  %1051 = vtanh.f32 %v440_v31  ;;  %v441_v35 = vmul.f32 0.7978846, %v431_v32 }
  0xff   : > { %v393_v30 = vmul.f32 0.5, %v1286_v29 }
 0x100   : > { %v413_v36 = vmul.f32 %v403_v34, %v1286_v29  ;;  %1053 = vtanh.f32 %v441_v35  ;;  %v422_v37 = vmul.f32 %v412_v33, %v1282_v23 }
 0x101   : > { %v367_v38 = vpop.f32.mrb[8].mxu0 }
 0x102   : > { %v1293_v39 = vadd.f32 %v1277_v10, %v367_v38  ;;  %v928_v40 = vpop.f32.mrb[9].mxu0  ;;  %v432_v41 = vadd.f32 %v422_v37, %v1282_v23  ;;  %v423_v42 = vmul.f32 %v413_v36, %v1286_v29 }
 0x103   : > { %v370_v43 = vpop.f32.mrb[10].mxu0 }
 0x104   : > { %v404_v44 = vmul.f32 0.044715, %v1293_v39  ;;  %v1299_v45 = vadd.f32 %v1277_v10, %v370_v43  ;;  %v929_v46 = vpop.f32.mrb[11].mxu0  ;;  %v442_v47 = vmul.f32 0.7978846, %v432_v41  ;;  %v433_v48 = vadd.f32 %v423_v42, %v1286_v29 }
 0x106   : > { %v414_v49 = vmul.f32 %v404_v44, %v1293_v39  ;;  %v405_v50 = vmul.f32 0.044715, %v1299_v45  ;;  %1055 = vtanh.f32 %v442_v47  ;;  %v443_v51 = vmul.f32 0.7978846, %v433_v48 }
 0x108   : > { %v1052_v52 = vpop.eup %1051  ;;  %v415_v53 = vmul.f32 %v405_v50, %v1299_v45  ;;  %1057 = vtanh.f32 %v443_v51  ;;  %v424_v54 = vmul.f32 %v414_v49, %v1293_v39  ;;  %v395_v49 = vmul.f32 0.5, %v1299_v45 }
 0x109   : > { %v375_v55 = vpop.f32.mrb[12].mxu0  ;;  %v460_v57 = vadd.f32 1.0, %v1052_v52 }
 0x10a   : > { %v1054_v58 = vpop.eup %1053  ;;  %v1307_v59 = vadd.f32 %v1277_v10, %v375_v55  ;;  %v932_v60 = vpop.f32.mrb[13].mxu0  ;;  %v425_v61 = vmul.f32 %v415_v53, %v1299_v45  ;;  %v434_v62 = vadd.f32 %v424_v54, %v1293_v39  ;;  %v394_v55 = vmul.f32 0.5, %v1293_v39 }
 0x10b   : > { %v378_v63 = vpop.f32.mrb[14].mxu0  ;;  %v1311_v0 = vmul.f32 %v460_v57, %v390_v56  ;;  %v461_v3 = vadd.f32 1.0, %v1054_v58 }
 0x10c   : > { %v406_v4 = vmul.f32 0.044715, %v1307_v59  ;;  %v1315_v5 = vadd.f32 %v1277_v10, %v378_v63  ;;  %v933_v6 = vpop.f32.mrb[15].mxu0  ;;  %v435_v7 = vadd.f32 %v425_v61, %v1299_v45  ;;  %v444_v8 = vmul.f32 0.7978846, %v434_v62  ;;  %v1043_v45 = vld [vmem:[%s1562_s3] sm:$0xff]  }
 0x10d   : > { %480 = vadd.xlane.f32.xlu0 %v1311_v0  ;;  %v1319_v9 = vmul.f32 %v461_v3, %v391_v2  ;;  %v500_v48 = vmul.f32 %v1311_v0, %v1311_v0  ;;  %982 = vmatpush3.bf16.msra.mxu1 %v1043_v45  ;;  %v1044_v3 = vld [vmem:[%s1562_s3 + $0x8] sm:$0xff]   ;;  %v396_v6 = vmul.f32 0.5, %v1307_v59 }
 0x10e   : > { %v416_v11 = vmul.f32 %v406_v4, %v1307_v59  ;;  %v407_v12 = vmul.f32 0.044715, %v1315_v5  ;;  %v445_v13 = vmul.f32 0.7978846, %v435_v7  ;;  %1059 = vtanh.f32 %v444_v8  ;;  %939 = vmatpush3.bf16.msra.mxu0 %v1043_v45  ;;  %975 = vmatprep.subr.bf16.mxu1 %v1155_v1  ;;  %v1045_v8 = vld [vmem:[%s1562_s3 + $0x10] sm:$0xff]  }
 0x10f   : > { %482 = vadd.xlane.f32.xlu1 %v1319_v9  ;;  %v501_v18 = vmul.f32 %v1319_v9, %v1319_v9  ;;  %v397_v62 = vmul.f32 0.5, %v1315_v5  ;;  %940 = vmatprep.subr.bf16.mxu0 %v1155_v1 }
 0x110   : > { %v1056_v14 = vpop.eup %1055  ;;  %v417_v15 = vmul.f32 %v407_v12, %v1315_v5  ;;  %1061 = vtanh.f32 %v445_v13  ;;  %v426_v16 = vmul.f32 %v416_v11, %v1307_v59 }
 0x111   : > { %v383_v17 = vpop.f32.mrb[16].mxu0  ;;  %v462_v20 = vadd.f32 1.0, %v1056_v14  ;;  %983 = vmatpush3.bf16.msra.mxu1 %v1044_v3 }
 0x112   : > { %v1058_v21 = vpop.eup %1057  ;;  %v1330_v22 = vadd.f32 %v1277_v10, %v383_v17  ;;  %v936_v24 = vpop.f32.mrb[17].mxu0  ;;  %v427_v25 = vmul.f32 %v417_v15, %v1315_v5  ;;  %v436_v26 = vadd.f32 %v426_v16, %v1307_v59  ;;  %941 = vmatpush3.bf16.msra.mxu0 %v1044_v3  ;;  %976 = vmatprep.subr.bf16.mxu1 %v1155_v1  ;;  %v1046_v16 = vld [vmem:[%s1562_s3 + $0x18] sm:$0xff]  }
 0x113   : > { %512 = vadd.xlane.f32.xlu1 %v501_v18  ;;  %v386_v27 = vpop.f32.mrb[18].mxu0  ;;  %v1334_v28 = vmul.f32 %v462_v20, %v392_v19  ;;  %v463_v31 = vadd.f32 1.0, %v1058_v21  ;;  %942 = vmatprep.subr.bf16.mxu0 %v1155_v1  ;;  %v1047_v20 = vld [vmem:[%s1562_s3 + $0x20] sm:$0xff]   ;;  %v1048_v24 = vld [vmem:[%s1562_s3 + $0x28] sm:$0xff]  }
 0x114   : > { %v408_v32 = vmul.f32 0.044715, %v1330_v22  ;;  %v1339_v23 = vadd.f32 %v1277_v10, %v386_v27  ;;  %v937_v33 = vpop.f32.mrb[19].mxu0  ;;  %v437_v34 = vadd.f32 %v427_v25, %v1315_v5  ;;  %v446_v35 = vmul.f32 0.7978846, %v436_v26  ;;  %v1049_v25 = vld [vmem:[%s1562_s3 + $0x30] sm:$0xff]  }
 0x115   : > { %484 = vadd.xlane.f32.xlu0 %v1334_v28  ;;  %v502_v36 = vmul.f32 %v1334_v28, %v1334_v28  ;;  %v1345_v37 = vmul.f32 %v463_v31, %v393_v30  ;;  %984 = vmatpush3.bf16.msra.mxu1 %v1045_v8  ;;  %v398_v18 = vmul.f32 0.5, %v1330_v22  ;;  %v1050_v26 = vld [vmem:[%s1562_s3 + $0x38] sm:$0xff]  }
 0x116   : > { %v418_v38 = vmul.f32 %v408_v32, %v1330_v22  ;;  %v409_v29 = vmul.f32 0.044715, %v1339_v23  ;;  %v447_v40 = vmul.f32 0.7978846, %v437_v34  ;;  %1063 = vtanh.f32 %v446_v35  ;;  %943 = vmatpush3.bf16.msra.mxu0 %v1045_v8  ;;  %977 = vmatprep.subr.bf16.mxu1 %v1155_v1 }
 0x117   : > { %514 = vadd.xlane.f32.xlu1 %v502_v36  ;;  %v503_v43 = vmul.f32 %v1345_v37, %v1345_v37  ;;  %v399_v13 = vmul.f32 0.5, %v1339_v23  ;;  %944 = vmatprep.subr.bf16.mxu0 %v1155_v1 }
 0x118   : > { %v1060_v10 = vpop.eup %1059  ;;  %v419_v41 = vmul.f32 %v409_v29, %v1339_v23  ;;  %1065 = vtanh.f32 %v447_v40  ;;  %v428_v42 = vmul.f32 %v418_v38, %v1330_v22 }
 0x119   : > { %486 = vadd.xlane.f32.xlu0 %v1345_v37  ;;  %v464_v51 = vadd.f32 1.0, %v1060_v10  ;;  %985 = vmatpush3.bf16.msra.mxu1 %v1046_v16 }
 0x11a   : > { %v1062_v44 = vpop.eup %1061  ;;  %v429_v46 = vmul.f32 %v419_v41, %v1339_v23  ;;  %v438_v47 = vadd.f32 %v428_v42, %v1330_v22  ;;  %945 = vmatpush3.bf16.msra.mxu0 %v1046_v16  ;;  %978 = vmatprep.subr.bf16.mxu1 %v1155_v1 }
 0x11b   : > { %516 = vadd.xlane.f32.xlu1 %v503_v43  ;;  %v465_v50 = vadd.f32 1.0, %v1062_v44  ;;  %v1364_v57 = vmul.f32 %v464_v51, %v394_v55  ;;  %946 = vmatprep.subr.bf16.mxu0 %v1155_v1 }
 0x11c   : > { %v439_v52 = vadd.f32 %v429_v46, %v1339_v23  ;;  %v448_v53 = vmul.f32 0.7978846, %v438_v47 }
 0x11d   : > { %510 = vadd.xlane.f32.xlu0 %v500_v48  ;;  %v1360_v54 = vmul.f32 %v465_v50, %v395_v49  ;;  %v504_v39 = vmul.f32 %v1364_v57, %v1364_v57  ;;  %986 = vmatpush3.bf16.msra.mxu1 %v1047_v20 }
 0x11e   : > { %v449_v56 = vmul.f32 0.7978846, %v439_v52  ;;  %1067 = vtanh.f32 %v448_v53  ;;  %947 = vmatpush3.bf16.msra.mxu0 %v1047_v20  ;;  %979 = vmatprep.subr.bf16.mxu1 %v1155_v1 }
 0x11f   : > { %490 = vadd.xlane.f32.xlu1 %v1360_v54  ;;  %v505_v60 = vmul.f32 %v1360_v54, %v1360_v54  ;;  %948 = vmatprep.subr.bf16.mxu0 %v1155_v1 }
 0x120   : > { %v1064_v58 = vpop.eup %1063  ;;  %1069 = vtanh.f32 %v449_v56 }
 0x121   : > { %488 = vadd.xlane.f32.xlu0 %v1364_v57  ;;  %v466_v2 = vadd.f32 1.0, %v1064_v58  ;;  %987 = vmatpush3.bf16.msra.mxu1 %v1048_v24 }
 0x122   : > { %v1066_v61 = vpop.eup %1065  ;;  %949 = vmatpush3.bf16.msra.mxu0 %v1048_v24  ;;  %980 = vmatprep.subr.bf16.mxu1 %v1155_v1 }
 0x123   : > { %520 = vadd.xlane.f32.xlu1 %v505_v60  ;;  %v467_v63 = vadd.f32 1.0, %v1066_v61  ;;  %v1384_v5 = vmul.f32 %v466_v2, %v396_v6  ;;  %950 = vmatprep.subr.bf16.mxu0 %v1155_v1 }
 0x125   : > { %518 = vadd.xlane.f32.xlu0 %v504_v39  ;;  %v1380_v4 = vmul.f32 %v467_v63, %v397_v62  ;;  %v506_v12 = vmul.f32 %v1384_v5, %v1384_v5  ;;  %988 = vmatpush3.bf16.msra.mxu1 %v1049_v25 }
 0x126   : > { %951 = vmatpush3.bf16.msra.mxu0 %v1049_v25  ;;  %981 = vmatprep.subr.bf16.mxu1 %v1155_v1 }
 0x127   : > { %494 = vadd.xlane.f32.xlu1 %v1380_v4  ;;  %v507_v59 = vmul.f32 %v1380_v4, %v1380_v4  ;;  %952 = vmatprep.subr.bf16.mxu0 %v1155_v1 }
 0x128   : > { %v1068_v7 = vpop.eup %1067 }
 0x129   : > { %492 = vadd.xlane.f32.xlu0 %v1384_v5  ;;  %v468_v15 = vadd.f32 1.0, %v1068_v7  ;;  %989 = vmatpush3.bf16.msra.mxu1 %v1050_v26 }
 0x12a   : > { %v1070_v11 = vpop.eup %1069  ;;  %953 = vmatpush3.bf16.msra.mxu0 %v1050_v26 }
 0x12b   : > { %524 = vadd.xlane.f32.xlu1 %v507_v59  ;;  %v469_v14 = vadd.f32 1.0, %v1070_v11  ;;  %v1406_v19 = vmul.f32 %v468_v15, %v398_v18 }
 0x12d   : > { %522 = vadd.xlane.f32.xlu0 %v506_v12  ;;  %v1402_v17 = vmul.f32 %v469_v14, %v399_v13  ;;  %v508_v22 = vmul.f32 %v1406_v19, %v1406_v19 }
 0x12f   : > { %498 = vadd.xlane.f32.xlu1 %v1402_v17  ;;  %v509_v21 = vmul.f32 %v1402_v17, %v1402_v17 }
 0x131   : > { %496 = vadd.xlane.f32.xlu0 %v1406_v19 }
 0x133   : > { %528 = vadd.xlane.f32.xlu1 %v509_v21 }
 0x135   : > { %526 = vadd.xlane.f32.xlu0 %v508_v22 }
 0x19a   : > { %v481_v30 = vpop.xlane.xlu0 %480 }
 0x19b   : > { %v1441_v41 = vmul.f32 0.010416667, %v481_v30 }
 0x19c   : > { %v483_v27 = vpop.xlane.xlu1 %482 }
 0x19d   : > { %v1433_v31 = vmul.f32 0.010416667, %v483_v27  ;;  %v550_v51 = vmul.f32 %v1441_v41, %v1441_v41 }
 0x19f   : > { %v551_v33 = vmul.f32 %v1433_v31, %v1433_v31 }
 0x1a0   : > { %v513_v32 = vpop.xlane.xlu1 %512 }
 0x1a1   : > { %v541_v23 = vmul.f32 0.010416667, %v513_v32 }
 0x1a2   : > { %v485_v34 = vpop.xlane.xlu0 %484 }
 0x1a3   : > { %v1437_v35 = vmul.f32 0.010416667, %v485_v34  ;;  %v561_v36 = vsub.f32 %v541_v23, %v551_v33 }
 0x1a4   : > { %v515_v38 = vpop.xlane.xlu1 %514 }
 0x1a5   : > { %v552_v29 = vmul.f32 %v1437_v35, %v1437_v35  ;;  %v542_v40 = vmul.f32 0.010416667, %v515_v38  ;;  %v571_v44 = vmax.f32 %v561_v36, 0.0 }
 0x1a6   : > { %v487_v10 = vpop.xlane.xlu0 %486 }
 0x1a7   : > { %v562_v42 = vsub.f32 %v542_v40, %v552_v29  ;;  %v1443_v43 = vmul.f32 0.010416667, %v487_v10  ;;  %v591_v53 = vadd.f32 1e-06, %v571_v44  ;;  %v580_v10 = vsub.f32 %v1311_v0, %v1441_v41 }
 0x1a8   : > { %v517_v46 = vpop.xlane.xlu1 %516  ;;  %v582_v44 = vsub.f32 %v1334_v28, %v1437_v35 }
 0x1a9   : > { %v572_v47 = vmax.f32 %v562_v42, 0.0  ;;  %v553_v48 = vmul.f32 %v1443_v43, %v1443_v43  ;;  %v543_v49 = vmul.f32 0.010416667, %v517_v46  ;;  %1071 = vrsqrt.f32 %v591_v53 }
 0x1aa   : > { %v511_v50 = vpop.xlane.xlu0 %510  ;;  %v583_v23 = vsub.f32 %v1345_v37, %v1443_v43  ;;  %v581_v42 = vsub.f32 %v1319_v9, %v1433_v31 }
 0x1ab   : > { %v540_v52 = vmul.f32 0.010416667, %v511_v50  ;;  %v563_v55 = vsub.f32 %v543_v49, %v553_v48  ;;  %v592_v58 = vadd.f32 1e-06, %v572_v47 }
 0x1ac   : > { %v491_v56 = vpop.xlane.xlu1 %490 }
 0x1ad   : > { %v560_v45 = vsub.f32 %v540_v52, %v550_v51  ;;  %v1449_v60 = vmul.f32 0.010416667, %v491_v56  ;;  %v573_v61 = vmax.f32 %v563_v55, 0.0  ;;  %1073 = vrsqrt.f32 %v592_v58 }
 0x1ae   : > { %v489_v39 = vpop.xlane.xlu0 %488 }
 0x1af   : > { %v570_v62 = vmax.f32 %v560_v45, 0.0  ;;  %v1451_v63 = vmul.f32 0.010416667, %v489_v39  ;;  %v593_v2 = vadd.f32 1e-06, %v573_v61  ;;  %v555_v7 = vmul.f32 %v1449_v60, %v1449_v60 }
 0x1b0   : > { %v521_v3 = vpop.xlane.xlu1 %520 }
 0x1b1   : > { %v590_v6 = vadd.f32 1e-06, %v570_v62  ;;  %v545_v8 = vmul.f32 0.010416667, %v521_v3  ;;  %1075 = vrsqrt.f32 %v593_v2  ;;  %v554_v11 = vmul.f32 %v1451_v63, %v1451_v63 }
 0x1b2   : > { %v519_v59 = vpop.xlane.xlu0 %518  ;;  %v585_v3 = vsub.f32 %v1360_v54, %v1449_v60 }
 0x1b3   : > { %1077 = vrsqrt.f32 %v590_v6  ;;  %v565_v12 = vsub.f32 %v545_v8, %v555_v7  ;;  %v544_v13 = vmul.f32 0.010416667, %v519_v59  ;;  %v1072_v32 = vpop.eup %1071  ;;  %v584_v6 = vsub.f32 %v1364_v57, %v1451_v63 }
 0x1b4   : > { %v495_v14 = vpop.xlane.xlu1 %494  ;;  %v611_v53 = vmul.f32 %v1072_v32, %v581_v42 }
 0x1b5   : > { %v575_v15 = vmax.f32 %v565_v12, 0.0  ;;  %v564_v16 = vsub.f32 %v544_v13, %v554_v11  ;;  %v1457_v18 = vmul.f32 0.010416667, %v495_v14 }
 0x1b6   : > { %v493_v20 = vpop.xlane.xlu0 %492 }
 0x1b7   : > { %v595_v21 = vadd.f32 1e-06, %v575_v15  ;;  %v574_v22 = vmax.f32 %v564_v16, 0.0  ;;  %v1459_v24 = vmul.f32 0.010416667, %v493_v20  ;;  %v557_v27 = vmul.f32 %v1457_v18, %v1457_v18  ;;  %v1074_v34 = vpop.eup %1073 }
 0x1b8   : > { %v525_v25 = vpop.xlane.xlu1 %524  ;;  %v612_v51 = vmul.f32 %v1074_v34, %v582_v44  ;;  %v587_v54 = vsub.f32 %v1380_v4, %v1457_v18 }
 0x1b9   : > { %1079 = vrsqrt.f32 %v595_v21  ;;  %v594_v26 = vadd.f32 1e-06, %v574_v22  ;;  %v547_v30 = vmul.f32 0.010416667, %v525_v25  ;;  %v556_v36 = vmul.f32 %v1459_v24, %v1459_v24 }
 0x1ba   : > { %v523_v33 = vpop.xlane.xlu0 %522  ;;  %v586_v57 = vsub.f32 %v1384_v5, %v1459_v24  ;;  %v875_v5 = vld [vmem:[%s1563_s4] ss:$0 sm:$0xff] }
 0x1bb   : > { %1081 = vrsqrt.f32 %v594_v26  ;;  %v567_v38 = vsub.f32 %v547_v30, %v557_v27  ;;  %v546_v29 = vmul.f32 0.010416667, %v523_v33  ;;  %v1076_v40 = vpop.eup %1075 }
 0x1bc   : > { %v499_v46 = vpop.xlane.xlu1 %498  ;;  %v613_v49 = vmul.f32 %v1076_v40, %v583_v23 }
 0x1bd   : > { %v1078_v37 = vpop.eup %1077  ;;  %v577_v43 = vmax.f32 %v567_v38, 0.0  ;;  %v566_v47 = vsub.f32 %v546_v29, %v556_v36  ;;  %v539_v48 = vmul.f32 0.010416667, %v499_v46 }
 0x1be   : > { %v497_v50 = vpop.xlane.xlu0 %496  ;;  %v610_v52 = vmul.f32 %v1078_v37, %v580_v10  ;;  %v621_v0 = vpack.c.bf16 %v613_v49, %v612_v51 }
 0x1bf   : > { %v597_v55 = vadd.f32 1e-06, %v577_v43  ;;  %v576_v56 = vmax.f32 %v566_v47, 0.0  ;;  %v538_v58 = vmul.f32 0.010416667, %v497_v50  ;;  %v559_v31 = vmul.f32 %v539_v48, %v539_v48 }
 0x1c0   : > { %v529_v41 = vpop.xlane.xlu1 %528  ;;  %v620_v45 = vpack.c.bf16 %v611_v53, %v610_v52  ;;  %959 = vmatmul.mubr.bf16.vlgmr.msra.gmra.mrb[0].mxu1 %v621_v0  ;;  %v589_v26 = vsub.f32 %v1402_v17, %v539_v48 }
 0x1c1   : > { %1083 = vrsqrt.f32 %v597_v55  ;;  %v596_v9 = vadd.f32 1e-06, %v576_v56  ;;  %v549_v28 = vmul.f32 0.010416667, %v529_v41  ;;  %v558_v39 = vmul.f32 %v538_v58, %v538_v58  ;;  %962 = vmatprep.mubr.msk.bf16.mxu1 %vm1156_vm0, %v1155_v1 }
 0x1c2   : > { %955 = vmatmul.mubr.bf16.vlgmr.msra.gmra.mrb[20].mxu0 %v620_v45  ;;  %v527_v35 = vpop.xlane.xlu0 %526  ;;  %v588_v27 = vsub.f32 %v1406_v19, %v538_v58 }
 0x1c3   : > { %v1080_v61 = vpop.eup %1079  ;;  %1085 = vrsqrt.f32 %v596_v9  ;;  %v569_v62 = vsub.f32 %v549_v28, %v559_v31  ;;  %v548_v2 = vmul.f32 0.010416667, %v527_v35 }
 0x1c4   : > { %v615_v12 = vmul.f32 %v1080_v61, %v585_v3 }
 0x1c5   : > { %v1082_v7 = vpop.eup %1081  ;;  %v579_v8 = vmax.f32 %v569_v62, 0.0  ;;  %v568_v59 = vsub.f32 %v548_v2, %v558_v39 }
 0x1c6   : > { %v614_v11 = vmul.f32 %v1082_v7, %v584_v6 }
 0x1c7   : > { %v599_v13 = vadd.f32 1e-06, %v579_v8  ;;  %v578_v14 = vmax.f32 %v568_v59, 0.0 }
 0x1c8   : > { %v622_v15 = vpack.c.bf16 %v615_v12, %v614_v11 }
 0x1c9   : > { %1087 = vrsqrt.f32 %v599_v13  ;;  %v598_v16 = vadd.f32 1e-06, %v578_v14 }
 0x1ca   : > { %963 = vmatmul.mubr.bf16.gmra.mrb[4].mxu1 %v622_v15 }
 0x1cb   : > { %v1084_v20 = vpop.eup %1083  ;;  %1089 = vrsqrt.f32 %v598_v16  ;;  %966 = vmatprep.mubr.msk.bf16.mxu1 %vm1156_vm0, %v1155_v1 }
 0x1cc   : > { %v617_v21 = vmul.f32 %v1084_v20, %v587_v54 }
 0x1cd   : > { %v1086_v60 = vpop.eup %1085 }
 0x1ce   : > { %v616_v63 = vmul.f32 %v1086_v60, %v586_v57 }
 0x1d0   : > { %v623_v22 = vpack.c.bf16 %v617_v21, %v616_v63 }
 0x1d2   : > { %967 = vmatmul.mubr.bf16.gmra.mrb[8].mxu1 %v623_v22 }
 0x1d3   : > { %v1088_v25 = vpop.eup %1087  ;;  %970 = vmatprep.mubr.msk.bf16.mxu1 %vm1156_vm0, %v1155_v1 }
 0x1d4   : > { %v619_v18 = vmul.f32 %v1088_v25, %v589_v26 }
 0x1d5   : > { %v1090_v30 = vpop.eup %1089 }
 0x1d6   : > { %v618_v4 = vmul.f32 %v1090_v30, %v588_v27 }
 0x1d8   : > { %v624_v32 = vpack.c.bf16 %v619_v18, %v618_v4 }
 0x1da   : > { %971 = vmatmul.mubr.bf16.gmra.mrb[12].mxu1 %v624_v32 }
 0x293   : > { %v738_v24 = vpop.f32.mrb[0].mxu1 }
 0x294   : > { %v739_v33 = vadd.f32 %v875_v5, %v738_v24  ;;  %v960_v1 = vpop.f32.mrb[1].mxu1 }
 0x295   : > { %v730_v23 = vpop.f32.mrb[20].mxu0  ;;  %v741_v36 = vpop.f32.mrb[2].mxu1 }
 0x296   : > { %v731_v34 = vadd.f32 %v875_v5, %v730_v23  ;;  %v956_v17 = vpop.f32.mrb[21].mxu0  ;;  %771 = vst [vmem:[%s1495_s8 + $0x10] sm:$0xff] %v739_v33  ;;  %v742_v38 = vadd.f32 %v875_v5, %v741_v36  ;;  %v961_v29 = vpop.f32.mrb[3].mxu1 }
 0x297   : > { %v733_v19 = vpop.f32.mrb[22].mxu0 }
 0x298   : > { %769 = vst [vmem:[%s1495_s8] sm:$0xff] %v731_v34  ;;  %v734_v40 = vadd.f32 %v875_v5, %v733_v19  ;;  %v957_v10 = vpop.f32.mrb[23].mxu0  ;;  %772 = vst [vmem:[%s1495_s8 + $0x18] sm:$0xff] %v742_v38 }
 0x29a   : > { %770 = vst [vmem:[%s1495_s8 + $0x8] sm:$0xff] %v734_v40 }
 0x29d   : > { %v746_v42 = vpop.f32.mrb[4].mxu1 }
 0x29e   : > { %v747_v44 = vadd.f32 %v875_v5, %v746_v42  ;;  %v964_v46 = vpop.f32.mrb[5].mxu1 }
 0x29f   : > { %v749_v37 = vpop.f32.mrb[6].mxu1 }
 0x2a0   : > { %773 = vst [vmem:[%s1495_s8 + $0x20] sm:$0xff] %v747_v44  ;;  %v750_v43 = vadd.f32 %v875_v5, %v749_v37  ;;  %v965_v47 = vpop.f32.mrb[7].mxu1 }
 0x2a2   : > { %774 = vst [vmem:[%s1495_s8 + $0x28] sm:$0xff] %v750_v43 }
 0x2a5   : > { %v754_v48 = vpop.f32.mrb[8].mxu1 }
 0x2a6   : > { %v755_v49 = vadd.f32 %v875_v5, %v754_v48  ;;  %v968_v50 = vpop.f32.mrb[9].mxu1 }
 0x2a7   : > { %v757_v51 = vpop.f32.mrb[10].mxu1 }
 0x2a8   : > { %775 = vst [vmem:[%s1495_s8 + $0x30] sm:$0xff] %v755_v49  ;;  %v758_v52 = vadd.f32 %v875_v5, %v757_v51  ;;  %v969_v53 = vpop.f32.mrb[11].mxu1 }
 0x2aa   : > { %776 = vst [vmem:[%s1495_s8 + $0x38] sm:$0xff] %v758_v52 }
 0x2ad   : > { %v762_v55 = vpop.f32.mrb[12].mxu1 }
 0x2ae   : > { %v763_v56 = vadd.f32 %v875_v5, %v762_v55  ;;  %v972_v58 = vpop.f32.mrb[13].mxu1 }
 0x2af   : > { %v765_v0 = vpop.f32.mrb[14].mxu1 }
 0x2b0   : > { %777 = vst [vmem:[%s1495_s8 + $0x40] sm:$0xff] %v763_v56  ;;  %v766_v41 = vadd.f32 %v875_v5, %v765_v0  ;;  %v973_v45 = vpop.f32.mrb[15].mxu1 }
 0x2b2   : > { %778 = vst [vmem:[%s1495_s8 + $0x48] sm:$0xff] %v766_v41 }
 0x2b3   : > { %1104 = shalt.err (!%p1101_p3)
}
 0x2b4   : > { %s1105_s23 = scalar_lea.hbm %s1513_s13, 1280  ;;  %s1109_s30 = scalar_lea.hbm %s1564_s5, 5120 }
 0x2b5   : > { %p1106_p4 = scmp.ne.s32.totalorder %s1513_s13, %s1105_s23  ;;  %p1110_p9 = scmp.lt.u32.totalorder %s1513_s13, %s1564_s5 }
 0x2b6   : > { %p1111_p10 = scmp.lt.u32.totalorder %s1109_s30, %s1105_s23  ;;  %p1113_p12 = scmp.lt.u32.totalorder %s1105_s23, %s1513_s13 }
 0x2b7   : > { %p1107_p7 = pnand %p1106_p4, %p1228_p5 }
 0x2b8   : > { %p1112_p11 = por %p1111_p10, %p1110_p9 }
 0x2b9   : > { %p1108_p8 = pneg %p1107_p7 }
 0x2ba   : > { %p1114_p13 = por %p1113_p12, %p1112_p11 }
 0x2bc   : > { %p1115_p0 = pnand %p1114_p13, %p1108_p8 }
 0x2be   : > { %1118 = shalt.err (!%p1115_p0)
}
 0x2bf   : > { %s1158_s8 = smov 128   ;;  %s1159_s9 = smov 8  }
 0x2c0   : > { %991 = dma.vmem_to_hbm [thread:$0]  (%p1228_p5), %s1507_s10, 1280, %s1513_s13, %s1518_s22, %s1158_s8, %s1158_s8, %s1159_s9  }
 0x2c1 PF: > { %p997_p1 = scmp.ge.s32.totalorder %s1153_s21, 2  ;;  %s808_s11 = sand.u32 1, %s1141_s18  }
 0x2c2   : > { %s809_s12 = scalar_lea.sflag [#allocation3], %s808_s11 }
 0x2c3   : > { %p994_p2 = pnand %p997_p1, %p1232_p6 }
 0x2c5   : > { %1136 = dma.done.wait (!%p994_p2), %s809_s12, 1280  }
 0x2c6   : > { %1138 = vsyncadd (!%p994_p2), %s809_s12, 4294966016  ;;  %p15_p3 = scmp.ge.s32.totalorder %s1215_s24, 6   ;;  %s1567_s18 = smov %s1145_s19 }
 0x2c7   : > { %s1568_s19 = smov %s1149_s20  ;;  %s1569_s20 = smov %s1226_s27 }
 0x2c8   : > { %s1570_s21 = smov %s1215_s24  ;;  %17 = sbr.rel (!%p15_p3) target bundleno = 3 (0x3), region = 75 }
 0x2cf   :  { %814 = vsyncpa [#allocation3], 1 }
 0x2d0   :  { %816 = vsyncpa [#allocation3 + $0x1], 1 }

</bundles_post_ra>
